<compile_context>
chip_gen: v7x
topology: tpu7x:2x2x1
jax: 0.10.0
libtpu: 0.0.40
codegen_flags: <defaults>
</compile_context>

<pallas_src>
import numpy as np
import jax
import jax.numpy as jnp
from jax.experimental import pallas as pl
from jax.experimental.pallas import tpu as pltpu

BN_EPS = 1e-5
_VMEM_LIMIT_BYTES = 48 * 1024 * 1024   # > default scoped limit everywhere, < v7x physical 64 MiB
_VMEM_TILE_BUDGET = 20 * 1024 * 1024   # target per-step (double-buffered) working set


def _round_up(x, m):
    return (x + m - 1) // m * m


def _const_block_spec(block_shape, index_map):
    """Constant-index blocks are revisited every grid step; pin them to a single
    VMEM buffer when the installed Pallas exposes pipeline_mode."""
    try:
        return pl.BlockSpec(block_shape, index_map, pipeline_mode=pl.Buffered(1))
    except (TypeError, AttributeError):
        return pl.BlockSpec(block_shape, index_map)


def _pick_tile_h(Hin, Win, Cin, Cq):
    """Largest h-tile whose double-buffered working set fits the VMEM budget."""
    lane_lhs = _round_up(3 * Cin * 2, 256)          # bf16 lhs row, lane-padded in VMEM
    lane_out = Cq * 2                               # bf16 out row (Cq is a multiple of 128)
    per_h = Win * (2 * lane_lhs + 2 * lane_out + 2 * Cq * 4) + 1   # + f32 y / y*y temps
    return int(max(1, min(_VMEM_TILE_BUDGET // per_h, Hin)))


# ------------------------------ forward --------------------------------------

def upconv_forward(x_nchw, conv_w, conv_b, bn_gamma, bn_beta, *, tile_h=None):
    """x_nchw: (N, Cin, Hin, Win) f32 -> (N, Cout, 2*Hin, 2*Win) f32."""
    # Training-mode BN subtracts the batch mean, so the per-channel conv bias
    # cancels exactly and is dropped from the matmul.
    # TODO(synk): reinstate conv_b if reused with eval-mode (running-stats) BN.
    del conv_b
    N, Cin, Hin, Win = map(int, x_nchw.shape)
    Cout = int(conv_w.shape[0])

    Cp = _round_up(Cout, 32)     # per-parity padded output channels
    Cq = 4 * Cp                  # kernel lane dim: (ph, pw, c), multiple of 128
    K3 = 3 * Cin                 # per-jh contraction depth, ordered (jw, ci)

    if tile_h is None:
        tile_h = _pick_tile_h(Hin, Win, Cin, Cq)
    TILE_H = int(max(1, min(tile_h, Hin)))
    TILE_P = TILE_H * Win                 # output pixels per grid step
    SLAB_R = (TILE_H + 2) * Win           # input rows per slab (2-row h halo)
    nT = -(-Hin // TILE_H)
    Hp = nT * TILE_H
    P0 = N * Hin * Win

    # ---------------- glue (wrapper-side XLA, fused copies) ------------------
    # Padded NHWC in bf16, w-direction 3-tap concat, grouped into h-slabs that
    # carry their own halo (row duplication overhead = 2 / TILE_H).
    x_nhwc = jnp.transpose(x_nchw, (0, 2, 3, 1)).astype(jnp.bfloat16)
    x_pad = jnp.pad(x_nhwc, ((0, 0), (1, Hp - Hin + 1), (1, 1), (0, 0)))
    p_rows = jnp.concatenate([x_pad[:, :, j:j + Win, :] for j in range(3)], axis=-1)
    slabs = jnp.stack(
        [p_rows[:, t * TILE_H:t * TILE_H + TILE_H + 2] for t in range(nT)], axis=1
    ).reshape(N * nT, SLAB_R, K3)
    n_slab = N * nT
    n_slab_2c = _round_up(n_slab, 2)      # even slab count for the 2-core split
    if n_slab_2c != n_slab:
        slabs = jnp.pad(slabs, ((0, n_slab_2c - n_slab), (0, 0), (0, 0)))
    per_core = n_slab_2c // 2

    # ------------- fold the nearest-2x upsample into the conv weights --------
    # Output parity ph selects which original-res rows each kernel row kh hits.
    A = jnp.array([[[1., 0., 0.],
                    [0., 1., 1.],
                    [0., 0., 0.]],
                   [[0., 0., 0.],
                    [1., 1., 0.],
                    [0., 0., 1.]]], dtype=jnp.float32)                # (parity, jh, kh)
    w_t = jnp.transpose(conv_w, (2, 3, 1, 0))                         # (kh, kw, ci, co)
    w_eff = jnp.einsum('pak,qbl,klcd->pqabcd', A, A, w_t)             # (ph,pw,jh,jw,ci,co)
    w_eff = jnp.pad(w_eff, ((0, 0),) * 5 + ((0, Cp - Cout),))
    # rows ordered (jh, jw, ci) to match the slab lanes; cols ordered (ph, pw, c)
    w_mat = jnp.transpose(w_eff, (2, 3, 4, 0, 1, 5)).reshape(3, K3, Cq)
    w_mat = w_mat.astype(jnp.bfloat16)
    # TODO(synk): per-parity matmul split (removes the 5/9 structurally-zero MXU
    # work, v5e compute-bound shapes) not applied while the kernel is mem-bound.

    def _conv_tile(p_ref, w_ref):
        # In-kernel h-direction im2col: three row-shifted views of the slab,
        # three accumulated MXU matmuls with f32 accumulation.
        y = jnp.dot(p_ref[0, 0:TILE_P, :], w_ref[0],
                    preferred_element_type=jnp.float32)
        for jh in (1, 2):
            y = y + jnp.dot(p_ref[0, jh * Win:jh * Win + TILE_P, :], w_ref[jh],
                            preferred_element_type=jnp.float32)
        return y                                         # (TILE_P, Cq) f32

    # ---------------- pass 1: per-column batch statistics --------------------
    def stats_kernel(p_ref, w_ref, sum_ref, sq_ref):
        c = pl.program_id(0)
        i = pl.program_id(1)

        @pl.when(i == 0)
        def _():
            sum_ref[...] = jnp.zeros_like(sum_ref)
            sq_ref[...] = jnp.zeros_like(sq_ref)

        y = _conv_tile(p_ref, w_ref)
        # Mask rows past the true image height (uneven last h-tile).  The extra
        # all-zero padding slabs produce exactly-zero conv output (no bias), so
        # they contribute nothing regardless of the mask.
        slab = c * per_core + i
        t = slab % nT
        valid_rows = jnp.minimum(TILE_H, Hin - t * TILE_H) * Win
        row_id = jax.lax.broadcasted_iota(jnp.int32, (TILE_P, 1), 0)
        y = jnp.where(row_id < valid_rows, y, 0.0)
        # TODO(synk): single-pass E[y^2]-E[y]^2 loses precision when |mean|>>std;
        # switch to shifted sums if that regime matters.
        sum_ref[...] += jnp.sum(y, axis=0)[None, None, :]
        sq_ref[...] += jnp.sum(y * y, axis=0)[None, None, :]

    stat_spec = pl.BlockSpec((1, 1, Cq), lambda c, i: (c, 0, 0))
    col_sum, col_sq = pl.pallas_call(
        stats_kernel,
        out_shape=(jax.ShapeDtypeStruct((2, 1, Cq), jnp.float32),
                   jax.ShapeDtypeStruct((2, 1, Cq), jnp.float32)),
        grid=(2, per_core),
        in_specs=[
            pl.BlockSpec((1, SLAB_R, K3), lambda c, i: (c * per_core + i, 0, 0)),
            _const_block_spec((3, K3, Cq), lambda c, i: (0, 0, 0)),
        ],
        out_specs=(stat_spec, stat_spec),
        compiler_params=pltpu.CompilerParams(
            dimension_semantics=("parallel", "arbitrary"),
            vmem_limit_bytes=_VMEM_LIMIT_BYTES),
        cost_estimate=pl.CostEstimate(
            flops=2 * n_slab_2c * TILE_P * 3 * K3 * Cq, transcendentals=0,
            bytes_accessed=n_slab_2c * SLAB_R * K3 * 2 + 3 * K3 * Cq * 2
                           + 4 * Cq * 4),
    )(slabs, w_mat)

    # Fold core partials + the 4 parity column groups into per-channel stats.
    count = jnp.float32(4 * P0)                      # = N * (2*Hin) * (2*Win)
    sum_c = jnp.sum(col_sum.reshape(8, Cp)[:, :Cout], axis=0)
    sq_c = jnp.sum(col_sq.reshape(8, Cp)[:, :Cout], axis=0)
    mean = sum_c / count
    var = sq_c / count - mean * mean                 # biased variance (training BN)
    scale_c = bn_gamma * jax.lax.rsqrt(var + BN_EPS)
    shift_c = bn_beta - mean * scale_c
    scale_cols = jnp.tile(jnp.pad(scale_c, (0, Cp - Cout)), 4).reshape(1, Cq)
    shift_cols = jnp.tile(jnp.pad(shift_c, (0, Cp - Cout)), 4).reshape(1, Cq)

    # -------- pass 2: recompute conv per tile, fused BN scale/shift + ReLU ----
    def apply_kernel(p_ref, w_ref, scale_ref, shift_ref, o_ref):
        y = _conv_tile(p_ref, w_ref)
        y = jnp.maximum(y * scale_ref[...] + shift_ref[...], 0.0)
        o_ref[0] = y.astype(o_ref.dtype)

    out_flat = pl.pallas_call(
        apply_kernel,
        out_shape=jax.ShapeDtypeStruct((n_slab, TILE_P, Cq), jnp.bfloat16),
        grid=(n_slab,),
        in_specs=[
            pl.BlockSpec((1, SLAB_R, K3), lambda i: (i, 0, 0)),
            _const_block_spec((3, K3, Cq), lambda i: (0, 0, 0)),
            _const_block_spec((1, Cq), lambda i: (0, 0)),
            _const_block_spec((1, Cq), lambda i: (0, 0)),
        ],
        out_specs=pl.BlockSpec((1, TILE_P, Cq), lambda i: (i, 0, 0)),
        compiler_params=pltpu.CompilerParams(
            dimension_semantics=("parallel",),
            vmem_limit_bytes=_VMEM_LIMIT_BYTES),
        cost_estimate=pl.CostEstimate(
            flops=2 * n_slab * TILE_P * 3 * K3 * Cq, transcendentals=0,
            bytes_accessed=n_slab * (SLAB_R * K3 * 2 + TILE_P * Cq * 2)
                           + 3 * K3 * Cq * 2 + 2 * Cq * 4),
    )(slabs, w_mat, scale_cols, shift_cols)

    # Parity de-interleave + NCHW transpose + f32 cast stay in bf16 until the
    # final cast so XLA fuses them into one read-bf16 / write-f32 pass.
    out = out_flat.reshape(N, Hp, Win, 2, 2, Cp)[:, :Hin, :, :, :, :Cout]
    out = jnp.transpose(out, (0, 5, 1, 3, 2, 4)).reshape(N, Cout, 2 * Hin, 2 * Win)
    return out.astype(jnp.float32)


# ------------------------------ reference ------------------------------------

def _reference_forward(x_nchw, conv_w, conv_b, bn_gamma, bn_beta):
    """Pure-JAX f32 reference matching PyTorch UpConv.forward (training BN)."""
    x_up = jnp.repeat(jnp.repeat(x_nchw, 2, axis=2), 2, axis=3)
    y = jax.lax.conv_general_dilated(
        x_up, conv_w, window_strides=(1, 1), padding=((1, 1), (1, 1)),
        dimension_numbers=("NCHW", "OIHW", "NCHW"))
    y = y + conv_b[None, :, None, None]
    mean = jnp.mean(y, axis=(0, 2, 3), keepdims=True)
    var = jnp.mean((y - mean) ** 2, axis=(0, 2, 3), keepdims=True)
    y = (y - mean) * jax.lax.rsqrt(var + BN_EPS)
    y = y * bn_gamma[None, :, None, None] + bn_beta[None, :, None, None]
    return jnp.maximum(y, 0.0)


if __name__ == "__main__":
    N, Cin, Cout, Hin, Win = 2, 4, 8, 16, 16

    key = jax.random.PRNGKey(0)
    kx, kw, kb, kg, kbeta = jax.random.split(key, 5)

    x = jax.random.normal(kx, (N, Cin, Hin, Win), dtype=jnp.float32)
    conv_w = 0.1 * jax.random.normal(kw, (Cout, Cin, 3, 3), dtype=jnp.float32)
    conv_b = 0.1 * jax.random.normal(kb, (Cout,), dtype=jnp.float32)
    bn_gamma = 1.0 + 0.1 * jax.random.normal(kg, (Cout,), dtype=jnp.float32)
    bn_beta = 0.1 * jax.random.normal(kbeta, (Cout,), dtype=jnp.float32)

    ref = jax.block_until_ready(
        _reference_forward(x, conv_w, conv_b, bn_gamma, bn_beta))

    fwd = jax.jit(upconv_forward, static_argnames=("tile_h",))
    # tile_h=None: auto tile (whole image per slab).  tile_h=6: deliberately
    # awkward tiling that exercises the h-halo slabs, the uneven-tail row mask
    # in the stats pass and the 2-core split with multiple steps per core.
    for th in (None, 6):
        out = jax.block_until_ready(
            fwd(x, conv_w, conv_b, bn_gamma, bn_beta, tile_h=th))
        assert out.shape == (N, Cout, 2 * Hin, 2 * Win), out.shape
        # bf16 MXU inputs + bf16 output store -> bf16-level tolerance vs f32 ref.
        np.testing.assert_allclose(np.asarray(out), np.asarray(ref),
                                   rtol=2e-2, atol=2e-2)
    print("KERNEL_OK")
</pallas_src>

<mosaic_0001>
module attributes {stable_mosaic.version = 11 : i64} {
  func.func @stats_kernel(%arg0: i32, %arg1: i32, %arg2: memref<1x288x12xbf16, #tpu.memory_space<vmem>>, %arg3: memref<3x12x128xbf16, #tpu.memory_space<vmem>>, %arg4: memref<1x1x128xf32, #tpu.memory_space<vmem>>, %arg5: memref<1x1x128xf32, #tpu.memory_space<vmem>>) attributes {dimension_semantics = [#tpu.dimension_semantics<parallel>, #tpu.dimension_semantics<arbitrary>], iteration_bounds = array<i64: 2, 1>, scalar_prefetch = 0 : i64, scratch_operands = 0 : i64, tpu.core_type = #tpu.core_type<tc>, window_params = [{transform_indices = @transform_0, window_bounds = array<i64: 1, 288, 12>}, {pipeline_mode = #tpu.pipeline_mode<synchronous>, transform_indices = @transform_1, window_bounds = array<i64: 3, 12, 128>}, {transform_indices = @transform_2, window_bounds = array<i64: 1, 1, 128>}, {transform_indices = @transform_3, window_bounds = array<i64: 1, 1, 128>}]} {
    %c0_i32 = arith.constant 0 : i32
    %0 = arith.cmpi eq, %arg1, %c0_i32 : i32
    %1 = arith.extui %0 : i1 to i32
    %c0_i32_0 = arith.constant 0 : i32
    %2 = arith.cmpi ne, %1, %c0_i32_0 : i32
    scf.if %2 {
      %cst_40 = arith.constant 0.000000e+00 : f32
      %54 = vector.broadcast %cst_40 : f32 to vector<1x1x128xf32>
      %c0_41 = arith.constant 0 : index
      %c0_42 = arith.constant 0 : index
      %c0_43 = arith.constant 0 : index
      %55 = vector.load %arg4[%c0_41, %c0_42, %c0_43] : memref<1x1x128xf32, #tpu.memory_space<vmem>>, vector<1x1x128xf32>
      tpu.vector_store %arg4[%c0_41, %c0_42, %c0_43], %54 {strides = array<i32>} : memref<1x1x128xf32, #tpu.memory_space<vmem>>, vector<1x1x128xf32>,
      %cst_44 = arith.constant 0.000000e+00 : f32
      %56 = vector.broadcast %cst_44 : f32 to vector<1x1x128xf32>
      %c0_45 = arith.constant 0 : index
      %c0_46 = arith.constant 0 : index
      %c0_47 = arith.constant 0 : index
      %57 = vector.load %arg5[%c0_45, %c0_46, %c0_47] : memref<1x1x128xf32, #tpu.memory_space<vmem>>, vector<1x1x128xf32>
      tpu.vector_store %arg5[%c0_45, %c0_46, %c0_47], %56 {strides = array<i32>} : memref<1x1x128xf32, #tpu.memory_space<vmem>>, vector<1x1x128xf32>,
    } else {
    }
    %c0 = arith.constant 0 : index
    %c0_1 = arith.constant 0 : index
    %c0_2 = arith.constant 0 : index
    %3 = vector.load %arg2[%c0, %c0_1, %c0_2] : memref<1x288x12xbf16, #tpu.memory_space<vmem>>, vector<1x256x12xbf16>
    %4 = vector.shape_cast %3 : vector<1x256x12xbf16> to vector<256x12xbf16>
    %c0_3 = arith.constant 0 : index
    %c0_4 = arith.constant 0 : index
    %c0_5 = arith.constant 0 : index
    %5 = vector.load %arg3[%c0_3, %c0_4, %c0_5] : memref<3x12x128xbf16, #tpu.memory_space<vmem>>, vector<1x12x128xbf16>
    %6 = vector.shape_cast %5 : vector<1x12x128xbf16> to vector<12x128xbf16>
    %cst = arith.constant dense<0.000000e+00> : vector<256x128xf32>
    %7 = tpu.matmul %4, %6, %cst {dimension_numbers = #tpu.dot_dimension_numbers<[1], [0], [0], [1], [0, 0, 1, 1], [], []>} : vector<256x12xbf16>, vector<12x128xbf16>, vector<256x128xf32> -> vector<256x128xf32>
    %c0_6 = arith.constant 0 : index
    %c16 = arith.constant 16 : index
    %c0_7 = arith.constant 0 : index
    %8 = vector.load %arg2[%c0_6, %c16, %c0_7] : memref<1x288x12xbf16, #tpu.memory_space<vmem>>, vector<1x256x12xbf16>
    %9 = vector.shape_cast %8 : vector<1x256x12xbf16> to vector<256x12xbf16>
    %c1 = arith.constant 1 : index
    %c0_8 = arith.constant 0 : index
    %c0_9 = arith.constant 0 : index
    %10 = vector.load %arg3[%c1, %c0_8, %c0_9] : memref<3x12x128xbf16, #tpu.memory_space<vmem>>, vector<1x12x128xbf16>
    %11 = vector.shape_cast %10 : vector<1x12x128xbf16> to vector<12x128xbf16>
    %cst_10 = arith.constant dense<0.000000e+00> : vector<256x128xf32>
    %12 = tpu.matmul %9, %11, %cst_10 {dimension_numbers = #tpu.dot_dimension_numbers<[1], [0], [0], [1], [0, 0, 1, 1], [], []>} : vector<256x12xbf16>, vector<12x128xbf16>, vector<256x128xf32> -> vector<256x128xf32>
    %13 = arith.addf %7, %12 : vector<256x128xf32>
    %c0_11 = arith.constant 0 : index
    %c32 = arith.constant 32 : index
    %c0_12 = arith.constant 0 : index
    %14 = vector.load %arg2[%c0_11, %c32, %c0_12] : memref<1x288x12xbf16, #tpu.memory_space<vmem>>, vector<1x256x12xbf16>
    %15 = vector.shape_cast %14 : vector<1x256x12xbf16> to vector<256x12xbf16>
    %c2 = arith.constant 2 : index
    %c0_13 = arith.constant 0 : index
    %c0_14 = arith.constant 0 : index
    %16 = vector.load %arg3[%c2, %c0_13, %c0_14] : memref<3x12x128xbf16, #tpu.memory_space<vmem>>, vector<1x12x128xbf16>
    %17 = vector.shape_cast %16 : vector<1x12x128xbf16> to vector<12x128xbf16>
    %cst_15 = arith.constant dense<0.000000e+00> : vector<256x128xf32>
    %18 = tpu.matmul %15, %17, %cst_15 {dimension_numbers = #tpu.dot_dimension_numbers<[1], [0], [0], [1], [0, 0, 1, 1], [], []>} : vector<256x12xbf16>, vector<12x128xbf16>, vector<256x128xf32> -> vector<256x128xf32>
    %19 = arith.addf %13, %18 : vector<256x128xf32>
    %c1_i32 = arith.constant 1 : i32
    %20 = arith.muli %arg0, %c1_i32 : i32
    %21 = arith.addi %20, %arg1 : i32
    %c1_i32_16 = arith.constant 1 : i32
    %c0_i32_17 = arith.constant 0 : i32
    %22 = arith.cmpi eq, %c1_i32_16, %c0_i32_17 : i32
    %c1_i32_18 = arith.constant 1 : i32
    %23 = arith.select %22, %c1_i32_18, %c1_i32_16 : i32
    %24 = arith.remsi %21, %23 : i32
    %c0_i32_19 = arith.constant 0 : i32
    %25 = arith.cmpi ne, %24, %c0_i32_19 : i32
    %c0_i32_20 = arith.constant 0 : i32
    %26 = arith.cmpi slt, %24, %c0_i32_20 : i32
    %c0_i32_21 = arith.constant 0 : i32
    %27 = arith.cmpi slt, %23, %c0_i32_21 : i32
    %28 = arith.xori %26, %27 : i1
    %29 = arith.andi %28, %25 : i1
    %30 = arith.addi %24, %23 : i32
    %31 = arith.select %29, %30, %24 : i32
    %c16_i32 = arith.constant 16 : i32
    %32 = arith.muli %31, %c16_i32 : i32
    %c16_i32_22 = arith.constant 16 : i32
    %33 = arith.subi %c16_i32_22, %32 : i32
    %c16_i32_23 = arith.constant 16 : i32
    %34 = arith.minsi %c16_i32_23, %33 : i32
    %c16_i32_24 = arith.constant 16 : i32
    %35 = arith.muli %34, %c16_i32_24 : i32
    %36 = tpu.iota {dimensions = array<i32: 0>} : vector<256x1xi32>
    %37 = vector.broadcast %35 : i32 to vector<256x1xi32>
    %38 = arith.cmpi slt, %36, %37 : vector<256x1xi32>
    %cst_25 = arith.constant 0.000000e+00 : f32
    %39 = vector.shape_cast %38 : vector<256x1xi1> to vector<256x1xi1>
    %40 = vector.broadcast %39 : vector<256x1xi1> to vector<256x128xi1>
    %41 = vector.broadcast %cst_25 : f32 to vector<256x128xf32>
    %42 = arith.select %40, %19, %41 : vector<256x128xi1>, vector<256x128xf32>
    %c0_26 = arith.constant 0 : index
    %c0_27 = arith.constant 0 : index
    %c0_28 = arith.constant 0 : index
    %43 = vector.load %arg4[%c0_26, %c0_27, %c0_28] : memref<1x1x128xf32, #tpu.memory_space<vmem>>, vector<1x1x128xf32>
    %cst_29 = arith.constant dense<0.000000e+00> : vector<128xf32>
    %44 = vector.multi_reduction <add>, %42, %cst_29 [0] : vector<256x128xf32> to vector<128xf32>
    %45 = vector.shape_cast %44 : vector<128xf32> to vector<1x1x128xf32>
    %46 = arith.addf %43, %45 : vector<1x1x128xf32>
    %c0_30 = arith.constant 0 : index
    %c0_31 = arith.constant 0 : index
    %c0_32 = arith.constant 0 : index
    %47 = vector.load %arg4[%c0_30, %c0_31, %c0_32] : memref<1x1x128xf32, #tpu.memory_space<vmem>>, vector<1x1x128xf32>
    tpu.vector_store %arg4[%c0_30, %c0_31, %c0_32], %46 {strides = array<i32>} : memref<1x1x128xf32, #tpu.memory_space<vmem>>, vector<1x1x128xf32>,
    %c0_33 = arith.constant 0 : index
    %c0_34 = arith.constant 0 : index
    %c0_35 = arith.constant 0 : index
    %48 = vector.load %arg5[%c0_33, %c0_34, %c0_35] : memref<1x1x128xf32, #tpu.memory_space<vmem>>, vector<1x1x128xf32>
    %49 = arith.mulf %42, %42 : vector<256x128xf32>
    %cst_36 = arith.constant dense<0.000000e+00> : vector<128xf32>
    %50 = vector.multi_reduction <add>, %49, %cst_36 [0] : vector<256x128xf32> to vector<128xf32>
    %51 = vector.shape_cast %50 : vector<128xf32> to vector<1x1x128xf32>
    %52 = arith.addf %48, %51 : vector<1x1x128xf32>
    %c0_37 = arith.constant 0 : index
    %c0_38 = arith.constant 0 : index
    %c0_39 = arith.constant 0 : index
    %53 = vector.load %arg5[%c0_37, %c0_38, %c0_39] : memref<1x1x128xf32, #tpu.memory_space<vmem>>, vector<1x1x128xf32>
    tpu.vector_store %arg5[%c0_37, %c0_38, %c0_39], %52 {strides = array<i32>} : memref<1x1x128xf32, #tpu.memory_space<vmem>>, vector<1x1x128xf32>,
    return
  }
  func.func @transform_0(%arg0: i32, %arg1: i32) -> (i32, i32, i32) {
    %c1_i32 = arith.constant 1 : i32
    %0 = arith.muli %arg0, %c1_i32 : i32
    %1 = arith.addi %0, %arg1 : i32
    %c0_i32 = arith.constant 0 : i32
    %c0_i32_0 = arith.constant 0 : i32
    %c0_i32_1 = arith.constant 0 : i32
    return %1, %c0_i32, %c0_i32_0 : i32, i32, i32
  }
  func.func @transform_1(%arg0: i32, %arg1: i32) -> (i32, i32, i32) {
    %c0_i32 = arith.constant 0 : i32
    %c0_i32_0 = arith.constant 0 : i32
    %c0_i32_1 = arith.constant 0 : i32
    %c0_i32_2 = arith.constant 0 : i32
    return %c0_i32, %c0_i32_0, %c0_i32_1 : i32, i32, i32
  }
  func.func @transform_2(%arg0: i32, %arg1: i32) -> (i32, i32, i32) {
    %c0_i32 = arith.constant 0 : i32
    %c0_i32_0 = arith.constant 0 : i32
    %c0_i32_1 = arith.constant 0 : i32
    return %arg0, %c0_i32, %c0_i32_0 : i32, i32, i32
  }
  func.func @transform_3(%arg0: i32, %arg1: i32) -> (i32, i32, i32) {
    %c0_i32 = arith.constant 0 : i32
    %c0_i32_0 = arith.constant 0 : i32
    %c0_i32_1 = arith.constant 0 : i32
    return %arg0, %c0_i32, %c0_i32_0 : i32, i32, i32
  }
}

module attributes {stable_mosaic.version = 11 : i64} {
  func.func @apply_kernel(%arg0: i32, %arg1: memref<1x288x12xbf16, #tpu.memory_space<vmem>>, %arg2: memref<3x12x128xbf16, #tpu.memory_space<vmem>>, %arg3: memref<1x128xf32, #tpu.memory_space<vmem>>, %arg4: memref<1x128xf32, #tpu.memory_space<vmem>>, %arg5: memref<1x256x128xbf16, #tpu.memory_space<vmem>>) attributes {dimension_semantics = [#tpu.dimension_semantics<parallel>], iteration_bounds = array<i64: 2>, scalar_prefetch = 0 : i64, scratch_operands = 0 : i64, tpu.core_type = #tpu.core_type<tc>, window_params = [{transform_indices = @transform_0, window_bounds = array<i64: 1, 288, 12>}, {pipeline_mode = #tpu.pipeline_mode<synchronous>, transform_indices = @transform_1, window_bounds = array<i64: 3, 12, 128>}, {pipeline_mode = #tpu.pipeline_mode<synchronous>, transform_indices = @transform_2, window_bounds = array<i64: 1, 128>}, {pipeline_mode = #tpu.pipeline_mode<synchronous>, transform_indices = @transform_3, window_bounds = array<i64: 1, 128>}, {transform_indices = @transform_4, window_bounds = array<i64: 1, 256, 128>}]} {
    %c0 = arith.constant 0 : index
    %c0_0 = arith.constant 0 : index
    %c0_1 = arith.constant 0 : index
    %0 = vector.load %arg1[%c0, %c0_0, %c0_1] : memref<1x288x12xbf16, #tpu.memory_space<vmem>>, vector<1x256x12xbf16>
    %1 = vector.shape_cast %0 : vector<1x256x12xbf16> to vector<256x12xbf16>
    %c0_2 = arith.constant 0 : index
    %c0_3 = arith.constant 0 : index
    %c0_4 = arith.constant 0 : index
    %2 = vector.load %arg2[%c0_2, %c0_3, %c0_4] : memref<3x12x128xbf16, #tpu.memory_space<vmem>>, vector<1x12x128xbf16>
    %3 = vector.shape_cast %2 : vector<1x12x128xbf16> to vector<12x128xbf16>
    %cst = arith.constant dense<0.000000e+00> : vector<256x128xf32>
    %4 = tpu.matmul %1, %3, %cst {dimension_numbers = #tpu.dot_dimension_numbers<[1], [0], [0], [1], [0, 0, 1, 1], [], []>} : vector<256x12xbf16>, vector<12x128xbf16>, vector<256x128xf32> -> vector<256x128xf32>
    %c0_5 = arith.constant 0 : index
    %c16 = arith.constant 16 : index
    %c0_6 = arith.constant 0 : index
    %5 = vector.load %arg1[%c0_5, %c16, %c0_6] : memref<1x288x12xbf16, #tpu.memory_space<vmem>>, vector<1x256x12xbf16>
    %6 = vector.shape_cast %5 : vector<1x256x12xbf16> to vector<256x12xbf16>
    %c1 = arith.constant 1 : index
    %c0_7 = arith.constant 0 : index
    %c0_8 = arith.constant 0 : index
    %7 = vector.load %arg2[%c1, %c0_7, %c0_8] : memref<3x12x128xbf16, #tpu.memory_space<vmem>>, vector<1x12x128xbf16>
    %8 = vector.shape_cast %7 : vector<1x12x128xbf16> to vector<12x128xbf16>
    %cst_9 = arith.constant dense<0.000000e+00> : vector<256x128xf32>
    %9 = tpu.matmul %6, %8, %cst_9 {dimension_numbers = #tpu.dot_dimension_numbers<[1], [0], [0], [1], [0, 0, 1, 1], [], []>} : vector<256x12xbf16>, vector<12x128xbf16>, vector<256x128xf32> -> vector<256x128xf32>
    %10 = arith.addf %4, %9 : vector<256x128xf32>
    %c0_10 = arith.constant 0 : index
    %c32 = arith.constant 32 : index
    %c0_11 = arith.constant 0 : index
    %11 = vector.load %arg1[%c0_10, %c32, %c0_11] : memref<1x288x12xbf16, #tpu.memory_space<vmem>>, vector<1x256x12xbf16>
    %12 = vector.shape_cast %11 : vector<1x256x12xbf16> to vector<256x12xbf16>
    %c2 = arith.constant 2 : index
    %c0_12 = arith.constant 0 : index
    %c0_13 = arith.constant 0 : index
    %13 = vector.load %arg2[%c2, %c0_12, %c0_13] : memref<3x12x128xbf16, #tpu.memory_space<vmem>>, vector<1x12x128xbf16>
    %14 = vector.shape_cast %13 : vector<1x12x128xbf16> to vector<12x128xbf16>
    %cst_14 = arith.constant dense<0.000000e+00> : vector<256x128xf32>
    %15 = tpu.matmul %12, %14, %cst_14 {dimension_numbers = #tpu.dot_dimension_numbers<[1], [0], [0], [1], [0, 0, 1, 1], [], []>} : vector<256x12xbf16>, vector<12x128xbf16>, vector<256x128xf32> -> vector<256x128xf32>
    %16 = arith.addf %10, %15 : vector<256x128xf32>
    %c0_15 = arith.constant 0 : index
    %c0_16 = arith.constant 0 : index
    %17 = vector.load %arg3[%c0_15, %c0_16] : memref<1x128xf32, #tpu.memory_space<vmem>>, vector<1x128xf32>
    %18 = vector.broadcast %17 : vector<1x128xf32> to vector<256x128xf32>
    %19 = arith.mulf %16, %18 : vector<256x128xf32>
    %c0_17 = arith.constant 0 : index
    %c0_18 = arith.constant 0 : index
    %20 = vector.load %arg4[%c0_17, %c0_18] : memref<1x128xf32, #tpu.memory_space<vmem>>, vector<1x128xf32>
    %21 = vector.broadcast %20 : vector<1x128xf32> to vector<256x128xf32>
    %22 = arith.addf %19, %21 : vector<256x128xf32>
    %cst_19 = arith.constant 0.000000e+00 : f32
    %23 = vector.broadcast %cst_19 : f32 to vector<256x128xf32>
    %24 = arith.maximumf %22, %23 : vector<256x128xf32>
    %25 = arith.truncf %24 : vector<256x128xf32> to vector<256x128xbf16>
    %c0_20 = arith.constant 0 : index
    %c0_21 = arith.constant 0 : index
    %c0_22 = arith.constant 0 : index
    %26 = vector.load %arg5[%c0_20, %c0_21, %c0_22] : memref<1x256x128xbf16, #tpu.memory_space<vmem>>, vector<1x256x128xbf16>
    %27 = vector.shape_cast %26 : vector<1x256x128xbf16> to vector<256x128xbf16>
    %28 = vector.shape_cast %25 : vector<256x128xbf16> to vector<1x256x128xbf16>
    tpu.vector_store %arg5[%c0_20, %c0_21, %c0_22], %28 {strides = array<i32>} : memref<1x256x128xbf16, #tpu.memory_space<vmem>>, vector<1x256x128xbf16>,
    return
  }
  func.func @transform_0(%arg0: i32) -> (i32, i32, i32) {
    %c0_i32 = arith.constant 0 : i32
    %c0_i32_0 = arith.constant 0 : i32
    %c0_i32_1 = arith.constant 0 : i32
    return %arg0, %c0_i32, %c0_i32_0 : i32, i32, i32
  }
  func.func @transform_1(%arg0: i32) -> (i32, i32, i32) {
    %c0_i32 = arith.constant 0 : i32
    %c0_i32_0 = arith.constant 0 : i32
    %c0_i32_1 = arith.constant 0 : i32
    %c0_i32_2 = arith.constant 0 : i32
    return %c0_i32, %c0_i32_0, %c0_i32_1 : i32, i32, i32
  }
  func.func @transform_2(%arg0: i32) -> (i32, i32) {
    %c0_i32 = arith.constant 0 : i32
    %c0_i32_0 = arith.constant 0 : i32
    %c0_i32_1 = arith.constant 0 : i32
    return %c0_i32, %c0_i32_0 : i32, i32
  }
  func.func @transform_3(%arg0: i32) -> (i32, i32) {
    %c0_i32 = arith.constant 0 : i32
    %c0_i32_0 = arith.constant 0 : i32
    %c0_i32_1 = arith.constant 0 : i32
    return %c0_i32, %c0_i32_0 : i32, i32
  }
  func.func @transform_4(%arg0: i32) -> (i32, i32, i32) {
    %c0_i32 = arith.constant 0 : i32
    %c0_i32_0 = arith.constant 0 : i32
    %c0_i32_1 = arith.constant 0 : i32
    return %arg0, %c0_i32, %c0_i32_0 : i32, i32, i32
  }
}

</mosaic_0001>

<bundles_post_ra>
// kernel: tile.13
= control target key start
LH: loop header
LB: loop body
LE: loop exit
PB: predicated region body
PF: predicated region fallthrough
CT: control target
= control target key end

     0   :  { %s22_s0 = inlined_call_operand.vmem [shape: f32[32], index: 0, kind: input, shape index: {}]   ;;  %s23_s1 = inlined_call_operand.vmem [shape: f32[4,32], index: 1, kind: output, shape index: {}]  }
   0x1   :  { %v4_v0 = vld [vmem:[%s22_s0] ss:$0 sm:$0xff] }
   0x2   :  { %5 = vst [vmem:[%s23_s1] sm:$0xf] %v4_v0 }

// kernel: tile.14
= control target key start
LH: loop header
LB: loop body
LE: loop exit
PB: predicated region body
PF: predicated region fallthrough
CT: control target
= control target key end

     0   :  { %vm7_vm0 = vcmask 261120   ;;  %s37_s8 = smov 32   ;;  %s38_s9 = smov 64   ;;  %vm13_vm1 = vcmask 1048320   ;;  %vm19_vm2 = vcmask 785920   ;;  %vm25_vm3 = vcmask 523520   ;;  %s55_s0 = inlined_call_operand.vmem [shape: f32[4,32], index: 0, kind: input, shape index: {}]   ;;  %s56_s1 = inlined_call_operand.vmem [shape: f32[1,128], index: 1, kind: output, shape index: {}]  }
   0x1   :  { %v4_v0 = vld [vmem:[%s55_s0] sm:$0xf]  ;;  %s36_s0 = smov 96  }
   0x2   :  { %5 = vst [vmem:[#allocation1] sm:$0xf] %v4_v0 }
   0x9   :  { %v10_v1 = vld [vmem:[#allocation1 + $0x3] sm:$0x1]   ;;  %v22_v2 = vld [vmem:[#allocation1 + $0x1] sm:$0x1]   ;;  %v6_v3 = vld [vmem:[#allocation1] sm:$0x1]  }
   0xa   :  { %11 = vrot.lane.b32.xlu0 %v10_v1, %s36_s0  ;;  %23 = vrot.lane.b32.xlu1 %v22_v2, %s37_s8  ;;  %v16_v4 = vld [vmem:[#allocation1 + $0x2] sm:$0x1]   ;;  %8 = vst.msk [vmem:[#allocation0] sm:$0x1] %vm7_vm0, %v6_v3  }
   0xe   :  { %17 = vrot.lane.b32.xlu0 %v16_v4, %s38_s9 }
  0x7c   :  { %v12_v5 = vpop.permute.xlu0 %11   ;;  %v24_v6 = vpop.permute.xlu1 %23  }
  0x7d   :  { %14 = vst.msk [vmem:[#allocation0] sm:$0x1] %vm13_vm1, %v12_v5  }
  0x80   :  { %v18_v7 = vpop.permute.xlu0 %17  }
  0x81   :  { %20 = vst.msk [vmem:[#allocation0] sm:$0x1] %vm19_vm2, %v18_v7  }
  0x82   :  { %26 = vst.msk [vmem:[#allocation0] sm:$0x1] %vm25_vm3, %v24_v6  }
  0x89   :  { %v30_v8 = vld [vmem:[#allocation0] sm:$0x1] }
  0x8a   :  { %32 = vst [vmem:[%s56_s1] sm:$0x1] %v30_v8 }

// kernel: upconv_forward.2
= control target key start
LH: loop header
LB: loop body
LE: loop exit
PB: predicated region body
PF: predicated region fallthrough
CT: control target
= control target key end

     0   :  { %s1860_s12 = smov 0   ;;  %s1862_s13 = smov 0   ;;  %s2016_s0 = inlined_call_operand.vmem [shape: bf16[2,288,12], index: 0, kind: input, shape index: {}]   ;;  %s2017_s1 = inlined_call_operand.vmem [shape: bf16[3,12,128], index: 1, kind: input, shape index: {}]   ;;  %s2018_s2 = inlined_call_operand.vmem [shape: f32[2,1,128], index: 2, kind: output, shape index: {0}]   ;;  %s2019_s3 = inlined_call_operand.vmem [shape: f32[2,1,128], index: 3, kind: output, shape index: {1}]  }
   0x1   :  { %s1864_s14 = smov 0  }
   0x2 LB: > { %s26_s15 = sadd.s32 1, %s1833_s13  ;;  %p1438_p0 = scmp.ge.s32.totalorder %s1837_s14, 1  ;;  %s1837_s14 = sphi %s1864_s14, %s14_s14   ;;  %s1833_s13 = sphi %s1862_s13, %s2021_s13   ;;  %s1829_s12 = sphi %s1860_s12, %s2020_s12  }
   0x3   : > { %p28_p1 = scmp.ge.s32.totalorder %s26_s15, 2  ;;  %p156_p2 = scmp.lt.s32.totalorder %s1837_s14, 3 }
   0x5   : > { %s2023_s15 = smov (%p28_p1, %s26_s15), 0  ;;  %p157_p3 = pnand %p1438_p0, %p156_p2 }
   0x6   : > { %v1779_v0 = vld [vmem:[%s2017_s1 + $0x8] sm:$0x3f] (!%p157_p3)   ;;  %vm375_vm0 = vcmask (!%p157_p3), 1045504   ;;  %p183_p4 = scmp.lt.s32.totalorder (!%p157_p3), %s1829_s12, 1  ;;  %v1780_v1 = vld [vmem:[%s2017_s1] sm:$0x3f] (!%p157_p3)  }
   0x7   : > { %160 = sbr.rel (%p157_p3) target bundleno = 348 (0x15c), region = 28  ;;  %1749 = vmatprep.subr.msk.bf16.mxu1 (!%p157_p3), %vm375_vm0, %v1779_v0  ;;  %v377_v2 = vsel (!%p157_p3), %vm375_vm0, %v1779_v0, 0  ;;  %v1783_v3 = vld [vmem:[%s2017_s1 + $0x10] sm:$0x3f] (!%p157_p3)   ;;  %1750 = vmatprep.subr.msk.bf16.mxu0 (!%p157_p3), %vm375_vm0, %v1780_v1  ;;  %v554_v4 = vsel (!%p157_p3), %vm375_vm0, %v1780_v1, 0  ;;  %vm326_vm1 = vcmask (!%p157_p3), 97280  }
   0x8   : > { %1582 = vmatpush3.bf16.msra.mxu1 (!%p157_p3), %v377_v2  ;;  %1616 = vmatpush3.bf16.msra.mxu0 (!%p157_p3), %v554_v4  ;;  %v886_v8 = vsel (!%p157_p3), %vm375_vm0, %v1783_v3, 0  ;;  %v1839_v39 = vmov (!%p157_p3), 0.0  }
   0x9   : > { %1751 = vmatprep.subr.msk.bf16.mxu1 (!%p157_p3), %vm375_vm0, %v1780_v1  ;;  %1752 = vmatprep.subr.msk.bf16.mxu0 (!%p157_p3), %vm375_vm0, %v1783_v3 }
   0xe   : > { %s2025_s12 = smov (!%p183_p4, %s1829_s12), 1 }
   0xf   : > { %s1753_s22 = smul.u32 144, %s2025_s12  ;;  %s1987_s28 = scalar_lea.vmem %s2018_s2, %s2025_s12 }
  0x10   : > { %s1993_s4 = scalar_lea.vmem %s2019_s3, %s2025_s12  ;;  %200 = vst [vmem:[%s1987_s28] sm:$0x1] %v1839_v39 }
  0x11   : > { %s1899_s25 = scalar_lea.vmem %s2016_s0, %s1753_s22  ;;  %201 = vst [vmem:[%s1993_s4] sm:$0x1] %v1839_v39 }
  0x12   : > { %v1781_v5 = vld [vmem:[%s1899_s25 + $0x8] sm:$0xff]   ;;  %v1782_v6 = vld [vmem:[%s1899_s25] sm:$0xff]   ;;  %v1784_v7 = vld [vmem:[%s1899_s25 + $0x10] sm:$0xff]  }
  0x13   : > { %1583 = vmatprep.mubr.msk.bf16.mxu1 %vm326_vm1, %v1781_v5  ;;  %1617 = vmatprep.mubr.msk.bf16.mxu0 %vm326_vm1, %v1782_v6  ;;  %v1785_v9 = vld [vmem:[%s1899_s25 + $0x18] sm:$0xff]   ;;  %v1786_v10 = vld [vmem:[%s1899_s25 + $0x20] sm:$0xff]   ;;  %v1787_v11 = vld [vmem:[%s1899_s25 + $0x28] sm:$0xff]  }
  0x14   : > { %1584 = vmatmul.mubr.msk.bf16.vlgmr.msra.gmra.mrb[0].mxu1 %vm326_vm1, %v1784_v7  ;;  %1618 = vmatmul.mubr.msk.bf16.vlgmr.msra.gmra.mrb[0].mxu0 %vm326_vm1, %v1781_v5  ;;  %v1788_v12 = vld [vmem:[%s1899_s25 + $0x30] sm:$0xff]   ;;  %v1789_v13 = vld [vmem:[%s1899_s25 + $0x38] sm:$0xff]   ;;  %v1790_v14 = vld [vmem:[%s1899_s25 + $0x40] sm:$0xff]  }
  0x15   : > { %1684 = vmatpush3.bf16.msra.mxu1 %v554_v4  ;;  %1650 = vmatpush3.bf16.msra.mxu0 %v886_v8  ;;  %v1791_v15 = vld [vmem:[%s1899_s25 + $0x48] sm:$0xff]   ;;  %v1792_v16 = vld [vmem:[%s1899_s25 + $0x10] sm:$0xff]   ;;  %v1794_v18 = vld [vmem:[%s1899_s25 + $0x18] sm:$0xff]  }
  0x16   : > { %1587 = vmatprep.mubr.msk.bf16.mxu1 %vm326_vm1, %v1785_v9  ;;  %1621 = vmatprep.mubr.msk.bf16.mxu0 %vm326_vm1, %v1784_v7  ;;  %v1793_v17 = vld [vmem:[%s1899_s25 + $0x50] sm:$0xff]   ;;  %v1795_v19 = vld [vmem:[%s1899_s25 + $0x58] sm:$0xff]   ;;  %v1796_v20 = vld [vmem:[%s1899_s25 + $0x20] sm:$0xff]  }
  0x17   : > { %v1797_v21 = vld [vmem:[%s1899_s25 + $0x60] sm:$0xff]   ;;  %v1798_v22 = vld [vmem:[%s1899_s25 + $0x28] sm:$0xff]   ;;  %v1800_v24 = vld [vmem:[%s1899_s25 + $0x30] sm:$0xff]  }
  0x18   : > { %v1799_v23 = vld [vmem:[%s1899_s25 + $0x68] sm:$0xff]   ;;  %v1801_v25 = vld [vmem:[%s1899_s25 + $0x70] sm:$0xff]   ;;  %v1802_v26 = vld [vmem:[%s1899_s25 + $0x38] sm:$0xff]  }
  0x19   : > { %v1803_v27 = vld [vmem:[%s1899_s25 + $0x78] sm:$0xff]   ;;  %v1804_v28 = vld [vmem:[%s1899_s25 + $0x40] sm:$0xff]   ;;  %v1806_v30 = vld [vmem:[%s1899_s25 + $0x48] sm:$0xff]  }
  0x1a   : > { %v1805_v29 = vld [vmem:[%s1899_s25 + $0x80] sm:$0xff]   ;;  %v1807_v31 = vld [vmem:[%s1899_s25 + $0x50] sm:$0xff]   ;;  %v1808_v32 = vld [vmem:[%s1899_s25 + $0x58] sm:$0xff]  }
  0x1b   : > { %v1809_v33 = vld [vmem:[%s1899_s25 + $0x60] sm:$0xff]   ;;  %v1810_v34 = vld [vmem:[%s1899_s25 + $0x68] sm:$0xff]   ;;  %v1811_v35 = vld [vmem:[%s1899_s25 + $0x70] sm:$0xff]  }
  0x1c   : > { %1588 = vmatmul.mubr.msk.bf16.gmra.mrb[4].mxu1 %vm326_vm1, %v1786_v10  ;;  %1622 = vmatmul.mubr.msk.bf16.gmra.mrb[4].mxu0 %vm326_vm1, %v1785_v9  ;;  %v1812_v36 = vld [vmem:[%s1899_s25 + $0x78] sm:$0xff]   ;;  %v1813_v37 = vld [vmem:[%s1899_s25 + $0x80] sm:$0xff]   ;;  %v1814_v38 = vld [vmem:[%s1899_s25 + $0x88] sm:$0xff]  }
  0x1d   : > { %1591 = vmatprep.mubr.msk.bf16.mxu1 %vm326_vm1, %v1787_v11  ;;  %1625 = vmatprep.mubr.msk.bf16.mxu0 %vm326_vm1, %v1786_v10 }
  0x24   : > { %1592 = vmatmul.mubr.msk.bf16.gmra.mrb[8].mxu1 %vm326_vm1, %v1788_v12  ;;  %1626 = vmatmul.mubr.msk.bf16.gmra.mrb[8].mxu0 %vm326_vm1, %v1787_v11 }
  0x25   : > { %1595 = vmatprep.mubr.msk.bf16.mxu1 %vm326_vm1, %v1789_v13  ;;  %1629 = vmatprep.mubr.msk.bf16.mxu0 %vm326_vm1, %v1788_v12 }
  0x2c   : > { %1596 = vmatmul.mubr.msk.bf16.gmra.mrb[12].mxu1 %vm326_vm1, %v1790_v14  ;;  %1630 = vmatmul.mubr.msk.bf16.gmra.mrb[12].mxu0 %vm326_vm1, %v1789_v13 }
  0x2d   : > { %1599 = vmatprep.mubr.msk.bf16.mxu1 %vm326_vm1, %v1791_v15  ;;  %1651 = vmatprep.mubr.msk.bf16.mxu0 %vm326_vm1, %v1792_v16 }
  0x34   : > { %1600 = vmatmul.mubr.msk.bf16.gmra.mrb[16].mxu1 %vm326_vm1, %v1793_v17  ;;  %1652 = vmatmul.mubr.msk.bf16.vlgmr.msra.gmra.mrb[0].mxu0 %vm326_vm1, %v1794_v18 }
  0x35   : > { %1603 = vmatprep.mubr.msk.bf16.mxu1 %vm326_vm1, %v1795_v19  ;;  %1655 = vmatprep.mubr.msk.bf16.mxu0 %vm326_vm1, %v1796_v20 }
  0x3c   : > { %1604 = vmatmul.mubr.msk.bf16.gmra.mrb[20].mxu1 %vm326_vm1, %v1797_v21  ;;  %1656 = vmatmul.mubr.msk.bf16.gmra.mrb[4].mxu0 %vm326_vm1, %v1798_v22 }
  0x3d   : > { %1607 = vmatprep.mubr.msk.bf16.mxu1 %vm326_vm1, %v1799_v23  ;;  %1659 = vmatprep.mubr.msk.bf16.mxu0 %vm326_vm1, %v1800_v24 }
  0x44   : > { %1608 = vmatmul.mubr.msk.bf16.gmra.mrb[24].mxu1 %vm326_vm1, %v1801_v25  ;;  %1660 = vmatmul.mubr.msk.bf16.gmra.mrb[8].mxu0 %vm326_vm1, %v1802_v26 }
  0x45   : > { %1611 = vmatprep.mubr.msk.bf16.mxu1 %vm326_vm1, %v1803_v27  ;;  %1663 = vmatprep.mubr.msk.bf16.mxu0 %vm326_vm1, %v1804_v28 }
  0x4c   : > { %1612 = vmatmul.mubr.msk.bf16.gmra.mrb[28].mxu1 %vm326_vm1, %v1805_v29  ;;  %1664 = vmatmul.mubr.msk.bf16.gmra.mrb[12].mxu0 %vm326_vm1, %v1806_v30 }
  0x4d   : > { %1633 = vmatprep.mubr.msk.bf16.mxu1 %vm326_vm1, %v1790_v14  ;;  %1667 = vmatprep.mubr.msk.bf16.mxu0 %vm326_vm1, %v1807_v31 }
  0x54   : > { %1634 = vmatmul.mubr.msk.bf16.vlgmr.msra.gmra.mrb[16].mxu1 %vm326_vm1, %v1791_v15  ;;  %1668 = vmatmul.mubr.msk.bf16.gmra.mrb[16].mxu0 %vm326_vm1, %v1808_v32 }
  0x55   : > { %1637 = vmatprep.mubr.msk.bf16.mxu1 %vm326_vm1, %v1793_v17  ;;  %1671 = vmatprep.mubr.msk.bf16.mxu0 %vm326_vm1, %v1809_v33 }
  0x5c   : > { %1638 = vmatmul.mubr.msk.bf16.gmra.mrb[20].mxu1 %vm326_vm1, %v1795_v19  ;;  %1672 = vmatmul.mubr.msk.bf16.gmra.mrb[20].mxu0 %vm326_vm1, %v1810_v34 }
  0x5d   : > { %1641 = vmatprep.mubr.msk.bf16.mxu1 %vm326_vm1, %v1797_v21  ;;  %1675 = vmatprep.mubr.msk.bf16.mxu0 %vm326_vm1, %v1811_v35 }
  0x64   : > { %1642 = vmatmul.mubr.msk.bf16.gmra.mrb[24].mxu1 %vm326_vm1, %v1799_v23  ;;  %1676 = vmatmul.mubr.msk.bf16.gmra.mrb[24].mxu0 %vm326_vm1, %v1812_v36 }
  0x65   : > { %1645 = vmatprep.mubr.msk.bf16.mxu1 %vm326_vm1, %v1801_v25  ;;  %1679 = vmatprep.mubr.msk.bf16.mxu0 %vm326_vm1, %v1813_v37 }
  0x6c   : > { %1646 = vmatmul.mubr.msk.bf16.gmra.mrb[28].mxu1 %vm326_vm1, %v1803_v27  ;;  %1680 = vmatmul.mubr.msk.bf16.gmra.mrb[28].mxu0 %vm326_vm1, %v1814_v38 }
  0xe7   : > { %v1585_v40 = vpop.f32.mrb[0].mxu1 }
  0xe8   : > { %v413_v41 = vpop.f32.mrb[1].mxu1 }
  0xe9   : > { %v1586_v42 = vpop.f32.mrb[2].mxu1 }
  0xea   : > { %v416_v43 = vpop.f32.mrb[3].mxu1 }
  0xef   : > { %v1589_v44 = vpop.f32.mrb[4].mxu1 }
  0xf0   : > { %v429_v45 = vpop.f32.mrb[5].mxu1 }
  0xf1   : > { %v1590_v46 = vpop.f32.mrb[6].mxu1 }
  0xf2   : > { %v432_v47 = vpop.f32.mrb[7].mxu1 }
  0xf7   : > { %v1593_v48 = vpop.f32.mrb[8].mxu1 }
  0xf8   : > { %v445_v49 = vpop.f32.mrb[9].mxu1 }
  0xf9   : > { %v1594_v50 = vpop.f32.mrb[10].mxu1 }
  0xfa   : > { %v448_v51 = vpop.f32.mrb[11].mxu1 }
  0xff   : > { %v1597_v52 = vpop.f32.mrb[12].mxu1 }
 0x100   : > { %v461_v53 = vpop.f32.mrb[13].mxu1 }
 0x101   : > { %v1997_v54 = vpop.f32.mrb[14].mxu1 }
 0x102   : > { %v1999_v55 = vpop.f32.mrb[15].mxu1 }
 0x107   : > { %v1653_v56 = vpop.f32.mrb[0].mxu0 }
 0x108   : > { %v1685_v57 = vadd.f32 %v1653_v56, %v1585_v40  ;;  %v922_v58 = vpop.f32.mrb[1].mxu0 }
 0x109   : > { %v1686_v59 = vadd.f32 %v922_v58, %v413_v41  ;;  %v1654_v60 = vpop.f32.mrb[2].mxu0 }
 0x10a   : > { %v1687_v61 = vadd.f32 %v1654_v60, %v1586_v42  ;;  %v925_v62 = vpop.f32.mrb[3].mxu0  ;;  %v1285_v3 = vmul.f32 %v1685_v57, %v1685_v57 }
 0x10b   : > { %v1688_v63 = vadd.f32 %v925_v62, %v416_v43  ;;  %v1283_v0 = vmul.f32 %v1686_v59, %v1686_v59 }
 0x10c   : > { %v1286_v9 = vmul.f32 %v1687_v61, %v1687_v61 }
 0x10d   : > { %v1243_v1 = vadd.f32 %v1688_v63, %v1686_v59  ;;  %v1284_v2 = vmul.f32 %v1688_v63, %v1688_v63 }
 0x10f   : > { %v1244_v4 = vadd.f32 %v1685_v57, %v1243_v1  ;;  %v1315_v5 = vadd.f32 %v1284_v2, %v1283_v0  ;;  %v1657_v6 = vpop.f32.mrb[4].mxu0 }
 0x110   : > { %v1689_v7 = vadd.f32 %v1657_v6, %v1589_v44  ;;  %v938_v8 = vpop.f32.mrb[5].mxu0 }
 0x111   : > { %v1316_v10 = vadd.f32 %v1315_v5, %v1285_v3  ;;  %v1690_v11 = vadd.f32 %v938_v8, %v429_v45  ;;  %v1245_v12 = vadd.f32 %v1687_v61, %v1244_v4  ;;  %v1658_v13 = vpop.f32.mrb[6].mxu0 }
 0x112   : > { %v1691_v14 = vadd.f32 %v1658_v13, %v1590_v46  ;;  %v941_v15 = vpop.f32.mrb[7].mxu0  ;;  %v1289_v23 = vmul.f32 %v1689_v7, %v1689_v7 }
 0x113   : > { %v1246_v16 = vadd.f32 %v1690_v11, %v1245_v12  ;;  %v1287_v17 = vmul.f32 %v1690_v11, %v1690_v11  ;;  %v1317_v18 = vadd.f32 %v1316_v10, %v1286_v9  ;;  %v1692_v19 = vadd.f32 %v941_v15, %v432_v47 }
 0x114   : > { %v1290_v29 = vmul.f32 %v1691_v14, %v1691_v14 }
 0x115   : > { %v1318_v20 = vadd.f32 %v1317_v18, %v1287_v17  ;;  %v1247_v21 = vadd.f32 %v1692_v19, %v1246_v16  ;;  %v1288_v22 = vmul.f32 %v1692_v19, %v1692_v19 }
 0x117   : > { %v1248_v24 = vadd.f32 %v1689_v7, %v1247_v21  ;;  %v1319_v25 = vadd.f32 %v1318_v20, %v1288_v22  ;;  %v1661_v26 = vpop.f32.mrb[8].mxu0 }
 0x118   : > { %v1693_v27 = vadd.f32 %v1661_v26, %v1593_v48  ;;  %v954_v28 = vpop.f32.mrb[9].mxu0 }
 0x119   : > { %v1320_v30 = vadd.f32 %v1319_v25, %v1289_v23  ;;  %v1694_v31 = vadd.f32 %v954_v28, %v445_v49  ;;  %v1249_v32 = vadd.f32 %v1691_v14, %v1248_v24  ;;  %v1662_v33 = vpop.f32.mrb[10].mxu0 }
 0x11a   : > { %v1695_v34 = vadd.f32 %v1662_v33, %v1594_v50  ;;  %v957_v35 = vpop.f32.mrb[11].mxu0  ;;  %v1293_v43 = vmul.f32 %v1693_v27, %v1693_v27 }
 0x11b   : > { %v1250_v36 = vadd.f32 %v1694_v31, %v1249_v32  ;;  %v1291_v37 = vmul.f32 %v1694_v31, %v1694_v31  ;;  %v1321_v38 = vadd.f32 %v1320_v30, %v1290_v29  ;;  %v1696_v39 = vadd.f32 %v957_v35, %v448_v51 }
 0x11c   : > { %v1294_v56 = vmul.f32 %v1695_v34, %v1695_v34 }
 0x11d   : > { %v1322_v40 = vadd.f32 %v1321_v38, %v1291_v37  ;;  %v1251_v41 = vadd.f32 %v1696_v39, %v1250_v36  ;;  %v1292_v42 = vmul.f32 %v1696_v39, %v1696_v39 }
 0x11f   : > { %v1252_v44 = vadd.f32 %v1693_v27, %v1251_v41  ;;  %v1323_v45 = vadd.f32 %v1322_v40, %v1292_v42  ;;  %v1665_v46 = vpop.f32.mrb[12].mxu0 }
 0x120   : > { %v1697_v47 = vadd.f32 %v1665_v46, %v1597_v52  ;;  %v970_v48 = vpop.f32.mrb[13].mxu0 }
 0x121   : > { %v1324_v57 = vadd.f32 %v1323_v45, %v1293_v43  ;;  %v1698_v49 = vadd.f32 %v970_v48, %v461_v53  ;;  %v1253_v58 = vadd.f32 %v1695_v34, %v1252_v44  ;;  %v1666_v59 = vpop.f32.mrb[14].mxu0 }
 0x122   : > { %v1699_v50 = vadd.f32 %v1666_v59, %v1997_v54  ;;  %v973_v60 = vpop.f32.mrb[15].mxu0  ;;  %v1297_v3 = vmul.f32 %v1697_v47, %v1697_v47 }
 0x123   : > { %v1254_v61 = vadd.f32 %v1698_v49, %v1253_v58  ;;  %v1295_v62 = vmul.f32 %v1698_v49, %v1698_v49  ;;  %v1325_v51 = vadd.f32 %v1324_v57, %v1294_v56  ;;  %v1700_v63 = vadd.f32 %v973_v60, %v1999_v55 }
 0x124   : > { %v1298_v9 = vmul.f32 %v1699_v50, %v1699_v50 }
 0x125   : > { %v1326_v0 = vadd.f32 %v1325_v51, %v1295_v62  ;;  %v1255_v1 = vadd.f32 %v1700_v63, %v1254_v61  ;;  %v1296_v2 = vmul.f32 %v1700_v63, %v1700_v63 }
 0x127   : > { %v1256_v4 = vadd.f32 %v1697_v47, %v1255_v1  ;;  %v1327_v52 = vadd.f32 %v1326_v0, %v1296_v2  ;;  %v1635_v5 = vpop.f32.mrb[16].mxu1  ;;  %v1669_v6 = vpop.f32.mrb[16].mxu0 }
 0x128   : > { %v1701_v7 = vadd.f32 %v1669_v6, %v1635_v5  ;;  %v654_v53 = vpop.f32.mrb[17].mxu1  ;;  %v986_v8 = vpop.f32.mrb[17].mxu0 }
 0x129   : > { %v1328_v10 = vadd.f32 %v1327_v52, %v1297_v3  ;;  %v1702_v54 = vadd.f32 %v986_v8, %v654_v53  ;;  %v1257_v11 = vadd.f32 %v1699_v50, %v1256_v4  ;;  %v1636_v12 = vpop.f32.mrb[18].mxu1  ;;  %v1670_v13 = vpop.f32.mrb[18].mxu0 }
 0x12a   : > { %v1703_v14 = vadd.f32 %v1670_v13, %v1636_v12  ;;  %v657_v15 = vpop.f32.mrb[19].mxu1  ;;  %v989_v55 = vpop.f32.mrb[19].mxu0  ;;  %v1301_v23 = vmul.f32 %v1701_v7, %v1701_v7 }
 0x12b   : > { %v1258_v16 = vadd.f32 %v1702_v54, %v1257_v11  ;;  %v1299_v17 = vmul.f32 %v1702_v54, %v1702_v54  ;;  %v1329_v18 = vadd.f32 %v1328_v10, %v1298_v9  ;;  %v1704_v19 = vadd.f32 %v989_v55, %v657_v15 }
 0x12c   : > { %v1302_v31 = vmul.f32 %v1703_v14, %v1703_v14 }
 0x12d   : > { %v1330_v20 = vadd.f32 %v1329_v18, %v1299_v17  ;;  %v1259_v21 = vadd.f32 %v1704_v19, %v1258_v16  ;;  %v1300_v22 = vmul.f32 %v1704_v19, %v1704_v19 }
 0x12f   : > { %v1260_v24 = vadd.f32 %v1701_v7, %v1259_v21  ;;  %v1331_v25 = vadd.f32 %v1330_v20, %v1300_v22  ;;  %v1639_v26 = vpop.f32.mrb[20].mxu1  ;;  %v1673_v27 = vpop.f32.mrb[20].mxu0 }
 0x130   : > { %v1705_v28 = vadd.f32 %v1673_v27, %v1639_v26  ;;  %v670_v29 = vpop.f32.mrb[21].mxu1  ;;  %v1002_v30 = vpop.f32.mrb[21].mxu0 }
 0x131   : > { %v1332_v32 = vadd.f32 %v1331_v25, %v1301_v23  ;;  %v1706_v33 = vadd.f32 %v1002_v30, %v670_v29  ;;  %v1261_v34 = vadd.f32 %v1703_v14, %v1260_v24  ;;  %v1640_v35 = vpop.f32.mrb[22].mxu1  ;;  %v1674_v36 = vpop.f32.mrb[22].mxu0 }
 0x132   : > { %v1707_v37 = vadd.f32 %v1674_v36, %v1640_v35  ;;  %v673_v38 = vpop.f32.mrb[23].mxu1  ;;  %v1005_v39 = vpop.f32.mrb[23].mxu0  ;;  %v1305_v47 = vmul.f32 %v1705_v28, %v1705_v28 }
 0x133   : > { %v1262_v40 = vadd.f32 %v1706_v33, %v1261_v34  ;;  %v1303_v41 = vmul.f32 %v1706_v33, %v1706_v33  ;;  %v1333_v42 = vadd.f32 %v1332_v32, %v1302_v31  ;;  %v1708_v43 = vadd.f32 %v1005_v39, %v673_v38 }
 0x134   : > { %v1306_v60 = vmul.f32 %v1707_v37, %v1707_v37 }
 0x135   : > { %v1334_v44 = vadd.f32 %v1333_v42, %v1303_v41  ;;  %v1263_v45 = vadd.f32 %v1708_v43, %v1262_v40  ;;  %v1304_v46 = vmul.f32 %v1708_v43, %v1708_v43 }
 0x137   : > { %v1264_v48 = vadd.f32 %v1705_v28, %v1263_v45  ;;  %v1335_v56 = vadd.f32 %v1334_v44, %v1304_v46  ;;  %v1643_v57 = vpop.f32.mrb[24].mxu1  ;;  %v1677_v49 = vpop.f32.mrb[24].mxu0 }
 0x138   : > { %v1709_v58 = vadd.f32 %v1677_v49, %v1643_v57  ;;  %v686_v59 = vpop.f32.mrb[25].mxu1  ;;  %v1018_v50 = vpop.f32.mrb[25].mxu0  ;;  %v1282_v57 = vld [vmem:[%s1993_s4] sm:$0x1] }
 0x139   : > { %v1336_v61 = vadd.f32 %v1335_v56, %v1305_v47  ;;  %v1710_v62 = vadd.f32 %v1018_v50, %v686_v59  ;;  %v1265_v51 = vadd.f32 %v1707_v37, %v1264_v48  ;;  %v1644_v63 = vpop.f32.mrb[26].mxu1  ;;  %v1678_v0 = vpop.f32.mrb[26].mxu0  ;;  %v1242_v47 = vld [vmem:[%s1987_s28] sm:$0x1] }
 0x13a   : > { %v1711_v1 = vadd.f32 %v1678_v0, %v1644_v63  ;;  %v689_v2 = vpop.f32.mrb[27].mxu1  ;;  %v1021_v3 = vpop.f32.mrb[27].mxu0  ;;  %v1309_v9 = vmul.f32 %v1709_v58, %v1709_v58 }
 0x13b   : > { %v1266_v4 = vadd.f32 %v1710_v62, %v1265_v51  ;;  %v1307_v52 = vmul.f32 %v1710_v62, %v1710_v62  ;;  %v1337_v5 = vadd.f32 %v1336_v61, %v1306_v60  ;;  %v1712_v6 = vadd.f32 %v1021_v3, %v689_v2 }
 0x13c   : > { %v1310_v55 = vmul.f32 %v1711_v1, %v1711_v1 }
 0x13d   : > { %v1338_v7 = vadd.f32 %v1337_v5, %v1307_v52  ;;  %v1267_v53 = vadd.f32 %v1712_v6, %v1266_v4  ;;  %v1308_v8 = vmul.f32 %v1712_v6, %v1712_v6 }
 0x13f   : > { %v1268_v10 = vadd.f32 %v1709_v58, %v1267_v53  ;;  %v1339_v54 = vadd.f32 %v1338_v7, %v1308_v8  ;;  %v1647_v11 = vpop.f32.mrb[28].mxu1  ;;  %v1681_v12 = vpop.f32.mrb[28].mxu0 }
 0x140   : > { %v1713_v13 = vadd.f32 %v1681_v12, %v1647_v11  ;;  %v702_v14 = vpop.f32.mrb[29].mxu1  ;;  %v1034_v15 = vpop.f32.mrb[29].mxu0 }
 0x141   : > { %v1340_v16 = vadd.f32 %v1339_v54, %v1309_v9  ;;  %v1714_v17 = vadd.f32 %v1034_v15, %v702_v14  ;;  %v1269_v18 = vadd.f32 %v1711_v1, %v1268_v10  ;;  %v1648_v19 = vpop.f32.mrb[30].mxu1  ;;  %v1682_v20 = vpop.f32.mrb[30].mxu0 }
 0x142   : > { %v1715_v21 = vadd.f32 %v1682_v20, %v1648_v19  ;;  %v705_v22 = vpop.f32.mrb[31].mxu1  ;;  %v1037_v23 = vpop.f32.mrb[31].mxu0  ;;  %v1313_v31 = vmul.f32 %v1713_v13, %v1713_v13 }
 0x143   : > { %v1270_v24 = vadd.f32 %v1714_v17, %v1269_v18  ;;  %v1311_v25 = vmul.f32 %v1714_v17, %v1714_v17  ;;  %v1341_v26 = vadd.f32 %v1340_v16, %v1310_v55  ;;  %v1716_v27 = vadd.f32 %v1037_v23, %v705_v22 }
 0x144   : > { %v1314_v34 = vmul.f32 %v1715_v21, %v1715_v21 }
 0x145   : > { %v1342_v28 = vadd.f32 %v1341_v26, %v1311_v25  ;;  %v1271_v29 = vadd.f32 %v1716_v27, %v1270_v24  ;;  %v1312_v30 = vmul.f32 %v1716_v27, %v1716_v27 }
 0x147   : > { %v1272_v32 = vadd.f32 %v1713_v13, %v1271_v29  ;;  %v1343_v33 = vadd.f32 %v1342_v28, %v1312_v30 }
 0x149   : > { %v1273_v35 = vadd.f32 %v1715_v21, %v1272_v32  ;;  %v1344_v36 = vadd.f32 %v1343_v33, %v1313_v31 }
 0x14b   : > { %v1274_v37 = vrot.slane %v1273_v35, 4  ;;  %v1345_v38 = vadd.f32 %v1344_v36, %v1314_v34 }
 0x14d   : > { %v1275_v39 = vadd.f32 %v1274_v37, %v1273_v35  ;;  %v1346_v40 = vrot.slane %v1345_v38, 4 }
 0x14f   : > { %v1276_v41 = vrot.slane %v1275_v39, 2  ;;  %v1347_v42 = vadd.f32 %v1346_v40, %v1345_v38 }
 0x151   : > { %v1277_v43 = vadd.f32 %v1276_v41, %v1275_v39  ;;  %v1348_v44 = vrot.slane %v1347_v42, 2 }
 0x153   : > { %v1278_v45 = vrot.slane %v1277_v43, 1  ;;  %v1349_v46 = vadd.f32 %v1348_v44, %v1347_v42 }
 0x155   : > { %v1279_v48 = vadd.f32 %v1278_v45, %v1277_v43  ;;  %v1350_v56 = vrot.slane %v1349_v46, 1 }
 0x157   : > { %v1280_v49 = vadd.f32 %v1279_v48, %v1242_v47  ;;  %v1351_v58 = vadd.f32 %v1350_v56, %v1349_v46 }
 0x159   : > { %1281 = vst [vmem:[%s1987_s28] sm:$0x1] %v1280_v49  ;;  %v1352_v59 = vadd.f32 %v1351_v58, %v1282_v57 }
 0x15b   : > { %1353 = vst [vmem:[%s1993_s4] sm:$0x1] %v1352_v59 }
 0x15c PF: > { %s14_s14 = sadd.s32 1, %s1837_s14   ;;  %s2020_s12 = smov %s1833_s13 }
 0x15d   : > { %p11_p5 = scmp.ge.s32.totalorder %s14_s14, 4   ;;  %s2021_s13 = smov %s2023_s15 }
 0x15f   :  { %13 = sbr.rel (!%p11_p5) target bundleno = 2 (0x2), region = 76 }

// kernel: upconv_forward.3
= control target key start
LH: loop header
LB: loop body
LE: loop exit
PB: predicated region body
PF: predicated region fallthrough
CT: control target
= control target key end

     0   :  { %s1964_s15 = smov 0   ;;  %s2191_s0 = inlined_call_operand.vmem [shape: bf16[2,288,12], index: 0, kind: input, shape index: {}]   ;;  %s2192_s1 = inlined_call_operand.vmem [shape: bf16[3,12,128], index: 1, kind: input, shape index: {}]   ;;  %s2193_s2 = inlined_call_operand.vmem [shape: f32[1,128], index: 2, kind: input, shape index: {}]   ;;  %s2194_s3 = inlined_call_operand.vmem [shape: f32[1,128], index: 3, kind: input, shape index: {}]   ;;  %s2195_s4 = inlined_call_operand.vmem [shape: bf16[2,256,128], index: 4, kind: output, shape index: {}]  }
   0x1 LB: > { %s1403_s16 = sadd.s32 4294967295, %s1937_s15   ;;  %p1407_p0 = scmp.ge.s32.totalorder %s1937_s15, 1  ;;  %s1937_s15 = sphi %s1964_s15, %s14_s15  }
   0x2   : > { %p162_p1 = scmp.lt.s32.totalorder %s1937_s15, 3 }
   0x4   : > { %p163_p2 = pnand %p1407_p0, %p162_p1 }
   0x5   : > { %v1895_v0 = vld [vmem:[%s2192_s1 + $0x8] sm:$0x3f] (!%p163_p2)   ;;  %vm372_vm0 = vcmask (!%p163_p2), 1045504   ;;  %p188_p3 = scmp.lt.s32.totalorder (!%p163_p2), %s1403_s16, 1  ;;  %v1896_v1 = vld [vmem:[%s2192_s1] sm:$0x3f] (!%p163_p2)  }
   0x6   : > { %166 = sbr.rel (%p163_p2) target bundleno = 333 (0x14d), region = 36  ;;  %1882 = vmatprep.subr.msk.bf16.mxu1 (!%p163_p2), %vm372_vm0, %v1895_v0  ;;  %v374_v2 = vsel (!%p163_p2), %vm372_vm0, %v1895_v0, 0  ;;  %v1899_v3 = vld [vmem:[%s2192_s1 + $0x10] sm:$0x3f] (!%p163_p2)   ;;  %1883 = vmatprep.subr.msk.bf16.mxu0 (!%p163_p2), %vm372_vm0, %v1896_v1  ;;  %v551_v4 = vsel (!%p163_p2), %vm372_vm0, %v1896_v1, 0  ;;  %vm323_vm1 = vcmask (!%p163_p2), 97280  }
   0x7   : > { %1715 = vmatpush3.bf16.msra.mxu1 (!%p163_p2), %v374_v2  ;;  %1749 = vmatpush3.bf16.msra.mxu0 (!%p163_p2), %v551_v4  ;;  %v883_v8 = vsel (!%p163_p2), %vm372_vm0, %v1899_v3, 0  ;;  %v2090_v56 = vld [vmem:[%s2193_s2] ss:$0 sm:$0xff] (!%p163_p2) }
   0x8   : > { %1884 = vmatprep.subr.msk.bf16.mxu1 (!%p163_p2), %vm372_vm0, %v1896_v1  ;;  %1885 = vmatprep.subr.msk.bf16.mxu0 (!%p163_p2), %vm372_vm0, %v1899_v3  ;;  %v2095_v59 = vld [vmem:[%s2194_s3] ss:$0 sm:$0xff] (!%p163_p2) }
   0xd   : > { %s2197_s16 = smov (!%p188_p3, %s1403_s16), 1 }
   0xe   : > { %s1886_s23 = smul.u32 144, %s2197_s16  ;;  %s1535_s5 = sshll.u32 %s2197_s16, 7 }
   0xf   : > { %s2109_s8 = scalar_lea.vmem %s2195_s4, %s1535_s5 }
  0x10   : > { %s1993_s26 = scalar_lea.vmem %s2191_s0, %s1886_s23 }
  0x11   : > { %v1897_v5 = vld [vmem:[%s1993_s26 + $0x8] sm:$0xff]   ;;  %v1898_v6 = vld [vmem:[%s1993_s26] sm:$0xff]   ;;  %v1900_v7 = vld [vmem:[%s1993_s26 + $0x10] sm:$0xff]  }
  0x12   : > { %1716 = vmatprep.mubr.msk.bf16.mxu1 %vm323_vm1, %v1897_v5  ;;  %1750 = vmatprep.mubr.msk.bf16.mxu0 %vm323_vm1, %v1898_v6  ;;  %v1901_v9 = vld [vmem:[%s1993_s26 + $0x18] sm:$0xff]   ;;  %v1902_v10 = vld [vmem:[%s1993_s26 + $0x20] sm:$0xff]   ;;  %v1903_v11 = vld [vmem:[%s1993_s26 + $0x28] sm:$0xff]  }
  0x13   : > { %1717 = vmatmul.mubr.msk.bf16.vlgmr.msra.gmra.mrb[0].mxu1 %vm323_vm1, %v1900_v7  ;;  %1751 = vmatmul.mubr.msk.bf16.vlgmr.msra.gmra.mrb[0].mxu0 %vm323_vm1, %v1897_v5  ;;  %v1904_v12 = vld [vmem:[%s1993_s26 + $0x30] sm:$0xff]   ;;  %v1905_v13 = vld [vmem:[%s1993_s26 + $0x38] sm:$0xff]   ;;  %v1906_v14 = vld [vmem:[%s1993_s26 + $0x40] sm:$0xff]  }
  0x14   : > { %1817 = vmatpush3.bf16.msra.mxu1 %v551_v4  ;;  %1783 = vmatpush3.bf16.msra.mxu0 %v883_v8  ;;  %v1907_v15 = vld [vmem:[%s1993_s26 + $0x48] sm:$0xff]   ;;  %v1908_v16 = vld [vmem:[%s1993_s26 + $0x10] sm:$0xff]   ;;  %v1910_v18 = vld [vmem:[%s1993_s26 + $0x18] sm:$0xff]  }
  0x15   : > { %1720 = vmatprep.mubr.msk.bf16.mxu1 %vm323_vm1, %v1901_v9  ;;  %1754 = vmatprep.mubr.msk.bf16.mxu0 %vm323_vm1, %v1900_v7  ;;  %v1909_v17 = vld [vmem:[%s1993_s26 + $0x50] sm:$0xff]   ;;  %v1911_v19 = vld [vmem:[%s1993_s26 + $0x58] sm:$0xff]   ;;  %v1912_v20 = vld [vmem:[%s1993_s26 + $0x20] sm:$0xff]  }
  0x16   : > { %v1913_v21 = vld [vmem:[%s1993_s26 + $0x60] sm:$0xff]   ;;  %v1914_v22 = vld [vmem:[%s1993_s26 + $0x28] sm:$0xff]   ;;  %v1916_v24 = vld [vmem:[%s1993_s26 + $0x30] sm:$0xff]  }
  0x17   : > { %v1915_v23 = vld [vmem:[%s1993_s26 + $0x68] sm:$0xff]   ;;  %v1917_v25 = vld [vmem:[%s1993_s26 + $0x70] sm:$0xff]   ;;  %v1918_v26 = vld [vmem:[%s1993_s26 + $0x38] sm:$0xff]  }
  0x18   : > { %v1919_v27 = vld [vmem:[%s1993_s26 + $0x78] sm:$0xff]   ;;  %v1920_v28 = vld [vmem:[%s1993_s26 + $0x40] sm:$0xff]   ;;  %v1922_v30 = vld [vmem:[%s1993_s26 + $0x48] sm:$0xff]  }
  0x19   : > { %v1921_v29 = vld [vmem:[%s1993_s26 + $0x80] sm:$0xff]   ;;  %v1923_v31 = vld [vmem:[%s1993_s26 + $0x50] sm:$0xff]   ;;  %v1924_v32 = vld [vmem:[%s1993_s26 + $0x58] sm:$0xff]  }
  0x1a   : > { %v1925_v33 = vld [vmem:[%s1993_s26 + $0x60] sm:$0xff]   ;;  %v1926_v34 = vld [vmem:[%s1993_s26 + $0x68] sm:$0xff]   ;;  %v1927_v35 = vld [vmem:[%s1993_s26 + $0x70] sm:$0xff]  }
  0x1b   : > { %1721 = vmatmul.mubr.msk.bf16.gmra.mrb[4].mxu1 %vm323_vm1, %v1902_v10  ;;  %1755 = vmatmul.mubr.msk.bf16.gmra.mrb[4].mxu0 %vm323_vm1, %v1901_v9  ;;  %v1928_v36 = vld [vmem:[%s1993_s26 + $0x78] sm:$0xff]   ;;  %v1929_v37 = vld [vmem:[%s1993_s26 + $0x80] sm:$0xff]   ;;  %v1930_v38 = vld [vmem:[%s1993_s26 + $0x88] sm:$0xff]  }
  0x1c   : > { %1724 = vmatprep.mubr.msk.bf16.mxu1 %vm323_vm1, %v1903_v11  ;;  %1758 = vmatprep.mubr.msk.bf16.mxu0 %vm323_vm1, %v1902_v10 }
  0x23   : > { %1725 = vmatmul.mubr.msk.bf16.gmra.mrb[8].mxu1 %vm323_vm1, %v1904_v12  ;;  %1759 = vmatmul.mubr.msk.bf16.gmra.mrb[8].mxu0 %vm323_vm1, %v1903_v11 }
  0x24   : > { %1728 = vmatprep.mubr.msk.bf16.mxu1 %vm323_vm1, %v1905_v13  ;;  %1762 = vmatprep.mubr.msk.bf16.mxu0 %vm323_vm1, %v1904_v12 }
  0x2b   : > { %1729 = vmatmul.mubr.msk.bf16.gmra.mrb[12].mxu1 %vm323_vm1, %v1906_v14  ;;  %1763 = vmatmul.mubr.msk.bf16.gmra.mrb[12].mxu0 %vm323_vm1, %v1905_v13 }
  0x2c   : > { %1732 = vmatprep.mubr.msk.bf16.mxu1 %vm323_vm1, %v1907_v15  ;;  %1784 = vmatprep.mubr.msk.bf16.mxu0 %vm323_vm1, %v1908_v16 }
  0x33   : > { %1733 = vmatmul.mubr.msk.bf16.gmra.mrb[16].mxu1 %vm323_vm1, %v1909_v17  ;;  %1785 = vmatmul.mubr.msk.bf16.vlgmr.msra.gmra.mrb[0].mxu0 %vm323_vm1, %v1910_v18 }
  0x34   : > { %1736 = vmatprep.mubr.msk.bf16.mxu1 %vm323_vm1, %v1911_v19  ;;  %1788 = vmatprep.mubr.msk.bf16.mxu0 %vm323_vm1, %v1912_v20 }
  0x3b   : > { %1737 = vmatmul.mubr.msk.bf16.gmra.mrb[20].mxu1 %vm323_vm1, %v1913_v21  ;;  %1789 = vmatmul.mubr.msk.bf16.gmra.mrb[4].mxu0 %vm323_vm1, %v1914_v22 }
  0x3c   : > { %1740 = vmatprep.mubr.msk.bf16.mxu1 %vm323_vm1, %v1915_v23  ;;  %1792 = vmatprep.mubr.msk.bf16.mxu0 %vm323_vm1, %v1916_v24 }
  0x43   : > { %1741 = vmatmul.mubr.msk.bf16.gmra.mrb[24].mxu1 %vm323_vm1, %v1917_v25  ;;  %1793 = vmatmul.mubr.msk.bf16.gmra.mrb[8].mxu0 %vm323_vm1, %v1918_v26 }
  0x44   : > { %1744 = vmatprep.mubr.msk.bf16.mxu1 %vm323_vm1, %v1919_v27  ;;  %1796 = vmatprep.mubr.msk.bf16.mxu0 %vm323_vm1, %v1920_v28 }
  0x4b   : > { %1745 = vmatmul.mubr.msk.bf16.gmra.mrb[28].mxu1 %vm323_vm1, %v1921_v29  ;;  %1797 = vmatmul.mubr.msk.bf16.gmra.mrb[12].mxu0 %vm323_vm1, %v1922_v30 }
  0x4c   : > { %1766 = vmatprep.mubr.msk.bf16.mxu1 %vm323_vm1, %v1906_v14  ;;  %1800 = vmatprep.mubr.msk.bf16.mxu0 %vm323_vm1, %v1923_v31 }
  0x53   : > { %1767 = vmatmul.mubr.msk.bf16.vlgmr.msra.gmra.mrb[16].mxu1 %vm323_vm1, %v1907_v15  ;;  %1801 = vmatmul.mubr.msk.bf16.gmra.mrb[16].mxu0 %vm323_vm1, %v1924_v32 }
  0x54   : > { %1770 = vmatprep.mubr.msk.bf16.mxu1 %vm323_vm1, %v1909_v17  ;;  %1804 = vmatprep.mubr.msk.bf16.mxu0 %vm323_vm1, %v1925_v33 }
  0x5b   : > { %1771 = vmatmul.mubr.msk.bf16.gmra.mrb[20].mxu1 %vm323_vm1, %v1911_v19  ;;  %1805 = vmatmul.mubr.msk.bf16.gmra.mrb[20].mxu0 %vm323_vm1, %v1926_v34 }
  0x5c   : > { %1774 = vmatprep.mubr.msk.bf16.mxu1 %vm323_vm1, %v1913_v21  ;;  %1808 = vmatprep.mubr.msk.bf16.mxu0 %vm323_vm1, %v1927_v35 }
  0x63   : > { %1775 = vmatmul.mubr.msk.bf16.gmra.mrb[24].mxu1 %vm323_vm1, %v1915_v23  ;;  %1809 = vmatmul.mubr.msk.bf16.gmra.mrb[24].mxu0 %vm323_vm1, %v1928_v36 }
  0x64   : > { %1778 = vmatprep.mubr.msk.bf16.mxu1 %vm323_vm1, %v1917_v25  ;;  %1812 = vmatprep.mubr.msk.bf16.mxu0 %vm323_vm1, %v1929_v37 }
  0x6b   : > { %1779 = vmatmul.mubr.msk.bf16.gmra.mrb[28].mxu1 %vm323_vm1, %v1919_v27  ;;  %1813 = vmatmul.mubr.msk.bf16.gmra.mrb[28].mxu0 %vm323_vm1, %v1930_v38 }
  0xe6   : > { %v1718_v39 = vpop.f32.mrb[0].mxu1 }
  0xe7   : > { %v410_v40 = vpop.f32.mrb[1].mxu1 }
  0xe8   : > { %v1719_v41 = vpop.f32.mrb[2].mxu1 }
  0xe9   : > { %v413_v42 = vpop.f32.mrb[3].mxu1 }
  0xee   : > { %v1722_v43 = vpop.f32.mrb[4].mxu1 }
  0xef   : > { %v426_v44 = vpop.f32.mrb[5].mxu1 }
  0xf0   : > { %v1723_v45 = vpop.f32.mrb[6].mxu1 }
  0xf1   : > { %v429_v46 = vpop.f32.mrb[7].mxu1 }
  0xf6   : > { %v1726_v47 = vpop.f32.mrb[8].mxu1 }
  0xf7   : > { %v442_v48 = vpop.f32.mrb[9].mxu1 }
  0xf8   : > { %v1727_v49 = vpop.f32.mrb[10].mxu1 }
  0xf9   : > { %v2077_v50 = vpop.f32.mrb[11].mxu1 }
  0xfe   : > { %v2079_v51 = vpop.f32.mrb[12].mxu1 }
  0xff   : > { %v2081_v52 = vpop.f32.mrb[13].mxu1 }
 0x100   : > { %v2083_v53 = vpop.f32.mrb[14].mxu1 }
 0x101   : > { %v2085_v54 = vpop.f32.mrb[15].mxu1 }
 0x106   : > { %v1786_v55 = vpop.f32.mrb[0].mxu0 }
 0x107   : > { %v1818_v57 = vadd.f32 %v1786_v55, %v1718_v39  ;;  %v919_v58 = vpop.f32.mrb[1].mxu0 }
 0x108   : > { %v1819_v60 = vadd.f32 %v919_v58, %v410_v40  ;;  %v1787_v61 = vpop.f32.mrb[2].mxu0 }
 0x109   : > { %v1087_v62 = vmul.f32 %v1818_v57, %v2090_v56  ;;  %v1820_v63 = vadd.f32 %v1787_v61, %v1719_v41  ;;  %v922_v0 = vpop.f32.mrb[3].mxu0 }
 0x10a   : > { %v1085_v1 = vmul.f32 %v1819_v60, %v2090_v56  ;;  %v1821_v2 = vadd.f32 %v922_v0, %v413_v42 }
 0x10b   : > { %v1126_v3 = vadd.f32 %v2095_v59, %v1087_v62  ;;  %v1088_v4 = vmul.f32 %v1820_v63, %v2090_v56 }
 0x10c   : > { %v1124_v5 = vadd.f32 %v2095_v59, %v1085_v1  ;;  %v1086_v6 = vmul.f32 %v1821_v2, %v2090_v56 }
 0x10d   : > { %v1127_v7 = vadd.f32 %v2095_v59, %v1088_v4  ;;  %v1158_v10 = vmax.f32 %v1126_v3, 0.0 }
 0x10e   : > { %v1125_v8 = vadd.f32 %v2095_v59, %v1086_v6  ;;  %v1790_v9 = vpop.f32.mrb[4].mxu0  ;;  %v1156_v14 = vmax.f32 %v1124_v5, 0.0 }
 0x10f   : > { %v1159_v11 = vmax.f32 %v1127_v7, 0.0  ;;  %v1822_v12 = vadd.f32 %v1790_v9, %v1722_v43  ;;  %v935_v13 = vpop.f32.mrb[5].mxu0 }
 0x110   : > { %v1157_v15 = vmax.f32 %v1125_v8, 0.0  ;;  %v1823_v16 = vadd.f32 %v935_v13, %v426_v44  ;;  %v1791_v17 = vpop.f32.mrb[6].mxu0 }
 0x111   : > { %v1576_v18 = vpack.c.bf16 %v1159_v11, %v1158_v10  ;;  %v1091_v19 = vmul.f32 %v1822_v12, %v2090_v56  ;;  %v1824_v20 = vadd.f32 %v1791_v17, %v1723_v45  ;;  %v938_v21 = vpop.f32.mrb[7].mxu0 }
 0x112   : > { %v1571_v22 = vpack.c.bf16 %v1157_v15, %v1156_v14  ;;  %v1089_v23 = vmul.f32 %v1823_v16, %v2090_v56  ;;  %v1825_v24 = vadd.f32 %v938_v21, %v429_v46 }
 0x113   : > { %1648 = vst [vmem:[%s2109_s8 + $0x8] sm:$0xff] %v1576_v18   ;;  %v1130_v25 = vadd.f32 %v2095_v59, %v1091_v19  ;;  %v1092_v26 = vmul.f32 %v1824_v20, %v2090_v56 }
 0x114   : > { %1572 = vst [vmem:[%s2109_s8] sm:$0xff] %v1571_v22   ;;  %v1128_v27 = vadd.f32 %v2095_v59, %v1089_v23  ;;  %v1090_v28 = vmul.f32 %v1825_v24, %v2090_v56 }
 0x115   : > { %v1131_v29 = vadd.f32 %v2095_v59, %v1092_v26  ;;  %v1162_v32 = vmax.f32 %v1130_v25, 0.0 }
 0x116   : > { %v1129_v30 = vadd.f32 %v2095_v59, %v1090_v28  ;;  %v1794_v31 = vpop.f32.mrb[8].mxu0  ;;  %v1160_v36 = vmax.f32 %v1128_v27, 0.0 }
 0x117   : > { %v1163_v33 = vmax.f32 %v1131_v29, 0.0  ;;  %v1826_v34 = vadd.f32 %v1794_v31, %v1726_v47  ;;  %v951_v35 = vpop.f32.mrb[9].mxu0 }
 0x118   : > { %v1161_v37 = vmax.f32 %v1129_v30, 0.0  ;;  %v1827_v38 = vadd.f32 %v951_v35, %v442_v48  ;;  %v1795_v39 = vpop.f32.mrb[10].mxu0 }
 0x119   : > { %v1586_v40 = vpack.c.bf16 %v1163_v33, %v1162_v32  ;;  %v1095_v41 = vmul.f32 %v1826_v34, %v2090_v56  ;;  %v1828_v42 = vadd.f32 %v1795_v39, %v1727_v49  ;;  %v954_v43 = vpop.f32.mrb[11].mxu0 }
 0x11a   : > { %v1581_v44 = vpack.c.bf16 %v1161_v37, %v1160_v36  ;;  %v1093_v45 = vmul.f32 %v1827_v38, %v2090_v56  ;;  %v1829_v46 = vadd.f32 %v954_v43, %v2077_v50 }
 0x11b   : > { %1650 = vst [vmem:[%s2109_s8 + $0x18] sm:$0xff] %v1586_v40   ;;  %v1134_v55 = vadd.f32 %v2095_v59, %v1095_v41  ;;  %v1096_v47 = vmul.f32 %v1828_v42, %v2090_v56 }
 0x11c   : > { %1649 = vst [vmem:[%s2109_s8 + $0x10] sm:$0xff] %v1581_v44   ;;  %v1132_v57 = vadd.f32 %v2095_v59, %v1093_v45  ;;  %v1094_v48 = vmul.f32 %v1829_v46, %v2090_v56 }
 0x11d   : > { %v1135_v58 = vadd.f32 %v2095_v59, %v1096_v47  ;;  %v1166_v61 = vmax.f32 %v1134_v55, 0.0 }
 0x11e   : > { %v1133_v49 = vadd.f32 %v2095_v59, %v1094_v48  ;;  %v1798_v60 = vpop.f32.mrb[12].mxu0  ;;  %v1164_v0 = vmax.f32 %v1132_v57, 0.0 }
 0x11f   : > { %v1167_v62 = vmax.f32 %v1135_v58, 0.0  ;;  %v1830_v50 = vadd.f32 %v1798_v60, %v2079_v51  ;;  %v967_v63 = vpop.f32.mrb[13].mxu0 }
 0x120   : > { %v1165_v1 = vmax.f32 %v1133_v49, 0.0  ;;  %v1831_v2 = vadd.f32 %v967_v63, %v2081_v52  ;;  %v1799_v3 = vpop.f32.mrb[14].mxu0 }
 0x121   : > { %v1596_v4 = vpack.c.bf16 %v1167_v62, %v1166_v61  ;;  %v1099_v5 = vmul.f32 %v1830_v50, %v2090_v56  ;;  %v1832_v6 = vadd.f32 %v1799_v3, %v2083_v53  ;;  %v970_v7 = vpop.f32.mrb[15].mxu0 }
 0x122   : > { %v1591_v8 = vpack.c.bf16 %v1165_v1, %v1164_v0  ;;  %v1097_v9 = vmul.f32 %v1831_v2, %v2090_v56  ;;  %v1833_v10 = vadd.f32 %v970_v7, %v2085_v54 }
 0x123   : > { %1652 = vst [vmem:[%s2109_s8 + $0x28] sm:$0xff] %v1596_v4   ;;  %v1138_v51 = vadd.f32 %v2095_v59, %v1099_v5  ;;  %v1100_v11 = vmul.f32 %v1832_v6, %v2090_v56 }
 0x124   : > { %1651 = vst [vmem:[%s2109_s8 + $0x20] sm:$0xff] %v1591_v8   ;;  %v1136_v52 = vadd.f32 %v2095_v59, %v1097_v9  ;;  %v1098_v12 = vmul.f32 %v1833_v10, %v2090_v56 }
 0x125   : > { %v1139_v13 = vadd.f32 %v2095_v59, %v1100_v11  ;;  %v1170_v16 = vmax.f32 %v1138_v51, 0.0 }
 0x126   : > { %v1137_v53 = vadd.f32 %v2095_v59, %v1098_v12  ;;  %v1768_v14 = vpop.f32.mrb[16].mxu1  ;;  %v1802_v15 = vpop.f32.mrb[16].mxu0  ;;  %v1168_v20 = vmax.f32 %v1136_v52, 0.0 }
 0x127   : > { %v1171_v17 = vmax.f32 %v1139_v13, 0.0  ;;  %v1834_v18 = vadd.f32 %v1802_v15, %v1768_v14  ;;  %v651_v54 = vpop.f32.mrb[17].mxu1  ;;  %v983_v19 = vpop.f32.mrb[17].mxu0 }
 0x128   : > { %v1169_v21 = vmax.f32 %v1137_v53, 0.0  ;;  %v1835_v22 = vadd.f32 %v983_v19, %v651_v54  ;;  %v1769_v23 = vpop.f32.mrb[18].mxu1  ;;  %v1803_v24 = vpop.f32.mrb[18].mxu0 }
 0x129   : > { %v1606_v25 = vpack.c.bf16 %v1171_v17, %v1170_v16  ;;  %v1103_v26 = vmul.f32 %v1834_v18, %v2090_v56  ;;  %v1836_v27 = vadd.f32 %v1803_v24, %v1769_v23  ;;  %v654_v28 = vpop.f32.mrb[19].mxu1  ;;  %v986_v29 = vpop.f32.mrb[19].mxu0 }
 0x12a   : > { %v1601_v30 = vpack.c.bf16 %v1169_v21, %v1168_v20  ;;  %v1101_v31 = vmul.f32 %v1835_v22, %v2090_v56  ;;  %v1837_v32 = vadd.f32 %v986_v29, %v654_v28 }
 0x12b   : > { %1654 = vst [vmem:[%s2109_s8 + $0x38] sm:$0xff] %v1606_v25   ;;  %v1142_v33 = vadd.f32 %v2095_v59, %v1103_v26  ;;  %v1104_v34 = vmul.f32 %v1836_v27, %v2090_v56 }
 0x12c   : > { %1653 = vst [vmem:[%s2109_s8 + $0x30] sm:$0xff] %v1601_v30   ;;  %v1140_v35 = vadd.f32 %v2095_v59, %v1101_v31  ;;  %v1102_v36 = vmul.f32 %v1837_v32, %v2090_v56 }
 0x12d   : > { %v1143_v37 = vadd.f32 %v2095_v59, %v1104_v34  ;;  %v1174_v41 = vmax.f32 %v1142_v33, 0.0 }
 0x12e   : > { %v1141_v38 = vadd.f32 %v2095_v59, %v1102_v36  ;;  %v1772_v39 = vpop.f32.mrb[20].mxu1  ;;  %v1806_v40 = vpop.f32.mrb[20].mxu0  ;;  %v1172_v46 = vmax.f32 %v1140_v35, 0.0 }
 0x12f   : > { %v1175_v42 = vmax.f32 %v1143_v37, 0.0  ;;  %v1838_v43 = vadd.f32 %v1806_v40, %v1772_v39  ;;  %v667_v44 = vpop.f32.mrb[21].mxu1  ;;  %v999_v45 = vpop.f32.mrb[21].mxu0 }
 0x130   : > { %v1173_v55 = vmax.f32 %v1141_v38, 0.0  ;;  %v1839_v47 = vadd.f32 %v999_v45, %v667_v44  ;;  %v1773_v57 = vpop.f32.mrb[22].mxu1  ;;  %v1807_v48 = vpop.f32.mrb[22].mxu0 }
 0x131   : > { %v1616_v58 = vpack.c.bf16 %v1175_v42, %v1174_v41  ;;  %v1107_v49 = vmul.f32 %v1838_v43, %v2090_v56  ;;  %v1840_v60 = vadd.f32 %v1807_v48, %v1773_v57  ;;  %v670_v61 = vpop.f32.mrb[23].mxu1  ;;  %v1002_v62 = vpop.f32.mrb[23].mxu0 }
 0x132   : > { %v1611_v50 = vpack.c.bf16 %v1173_v55, %v1172_v46  ;;  %v1105_v63 = vmul.f32 %v1839_v47, %v2090_v56  ;;  %v1841_v0 = vadd.f32 %v1002_v62, %v670_v61 }
 0x133   : > { %1656 = vst [vmem:[%s2109_s8 + $0x48] sm:$0xff] %v1616_v58   ;;  %v1146_v1 = vadd.f32 %v2095_v59, %v1107_v49  ;;  %v1108_v2 = vmul.f32 %v1840_v60, %v2090_v56 }
 0x134   : > { %1655 = vst [vmem:[%s2109_s8 + $0x40] sm:$0xff] %v1611_v50   ;;  %v1144_v3 = vadd.f32 %v2095_v59, %v1105_v63  ;;  %v1106_v4 = vmul.f32 %v1841_v0, %v2090_v56 }
 0x135   : > { %v1147_v5 = vadd.f32 %v2095_v59, %v1108_v2  ;;  %v1178_v9 = vmax.f32 %v1146_v1, 0.0 }
 0x136   : > { %v1145_v6 = vadd.f32 %v2095_v59, %v1106_v4  ;;  %v1776_v7 = vpop.f32.mrb[24].mxu1  ;;  %v1810_v8 = vpop.f32.mrb[24].mxu0  ;;  %v1176_v12 = vmax.f32 %v1144_v3, 0.0 }
 0x137   : > { %v1179_v10 = vmax.f32 %v1147_v5, 0.0  ;;  %v1842_v51 = vadd.f32 %v1810_v8, %v1776_v7  ;;  %v683_v11 = vpop.f32.mrb[25].mxu1  ;;  %v1015_v52 = vpop.f32.mrb[25].mxu0 }
 0x138   : > { %v1177_v13 = vmax.f32 %v1145_v6, 0.0  ;;  %v1843_v53 = vadd.f32 %v1015_v52, %v683_v11  ;;  %v1777_v14 = vpop.f32.mrb[26].mxu1  ;;  %v1811_v15 = vpop.f32.mrb[26].mxu0 }
 0x139   : > { %v1626_v16 = vpack.c.bf16 %v1179_v10, %v1178_v9  ;;  %v1111_v17 = vmul.f32 %v1842_v51, %v2090_v56  ;;  %v1844_v18 = vadd.f32 %v1811_v15, %v1777_v14  ;;  %v686_v54 = vpop.f32.mrb[27].mxu1  ;;  %v1018_v19 = vpop.f32.mrb[27].mxu0 }
 0x13a   : > { %v1621_v20 = vpack.c.bf16 %v1177_v13, %v1176_v12  ;;  %v1109_v21 = vmul.f32 %v1843_v53, %v2090_v56  ;;  %v1845_v22 = vadd.f32 %v1018_v19, %v686_v54 }
 0x13b   : > { %1658 = vst [vmem:[%s2109_s8 + $0x58] sm:$0xff] %v1626_v16   ;;  %v1150_v23 = vadd.f32 %v2095_v59, %v1111_v17  ;;  %v1112_v24 = vmul.f32 %v1844_v18, %v2090_v56 }
 0x13c   : > { %1657 = vst [vmem:[%s2109_s8 + $0x50] sm:$0xff] %v1621_v20   ;;  %v1148_v25 = vadd.f32 %v2095_v59, %v1109_v21  ;;  %v1110_v26 = vmul.f32 %v1845_v22, %v2090_v56 }
 0x13d   : > { %v1151_v27 = vadd.f32 %v2095_v59, %v1112_v24  ;;  %v1182_v31 = vmax.f32 %v1150_v23, 0.0 }
 0x13e   : > { %v1149_v28 = vadd.f32 %v2095_v59, %v1110_v26  ;;  %v1780_v29 = vpop.f32.mrb[28].mxu1  ;;  %v1814_v30 = vpop.f32.mrb[28].mxu0  ;;  %v1180_v36 = vmax.f32 %v1148_v25, 0.0 }
 0x13f   : > { %v1183_v32 = vmax.f32 %v1151_v27, 0.0  ;;  %v1846_v33 = vadd.f32 %v1814_v30, %v1780_v29  ;;  %v699_v34 = vpop.f32.mrb[29].mxu1  ;;  %v1031_v35 = vpop.f32.mrb[29].mxu0 }
 0x140   : > { %v1181_v37 = vmax.f32 %v1149_v28, 0.0  ;;  %v1847_v38 = vadd.f32 %v1031_v35, %v699_v34  ;;  %v1781_v39 = vpop.f32.mrb[30].mxu1  ;;  %v1815_v40 = vpop.f32.mrb[30].mxu0 }
 0x141   : > { %v1636_v41 = vpack.c.bf16 %v1183_v32, %v1182_v31  ;;  %v1115_v42 = vmul.f32 %v1846_v33, %v2090_v56  ;;  %v1848_v43 = vadd.f32 %v1815_v40, %v1781_v39  ;;  %v702_v44 = vpop.f32.mrb[31].mxu1  ;;  %v1034_v45 = vpop.f32.mrb[31].mxu0 }
 0x142   : > { %v1631_v46 = vpack.c.bf16 %v1181_v37, %v1180_v36  ;;  %v1113_v55 = vmul.f32 %v1847_v38, %v2090_v56  ;;  %v1849_v47 = vadd.f32 %v1034_v45, %v702_v44 }
 0x143   : > { %1660 = vst [vmem:[%s2109_s8 + $0x68] sm:$0xff] %v1636_v41   ;;  %v1154_v57 = vadd.f32 %v2095_v59, %v1115_v42  ;;  %v1116_v48 = vmul.f32 %v1848_v43, %v2090_v56 }
 0x144   : > { %1659 = vst [vmem:[%s2109_s8 + $0x60] sm:$0xff] %v1631_v46   ;;  %v1152_v58 = vadd.f32 %v2095_v59, %v1113_v55  ;;  %v1114_v49 = vmul.f32 %v1849_v47, %v2090_v56 }
 0x145   : > { %v1155_v60 = vadd.f32 %v2095_v59, %v1116_v48  ;;  %v1186_v62 = vmax.f32 %v1154_v57, 0.0 }
 0x146   : > { %v1153_v61 = vadd.f32 %v2095_v59, %v1114_v49  ;;  %v1184_v63 = vmax.f32 %v1152_v58, 0.0 }
 0x147   : > { %v1187_v50 = vmax.f32 %v1155_v60, 0.0 }
 0x148   : > { %v1185_v0 = vmax.f32 %v1153_v61, 0.0 }
 0x149   : > { %v1646_v1 = vpack.c.bf16 %v1187_v50, %v1186_v62 }
 0x14a   : > { %v1641_v2 = vpack.c.bf16 %v1185_v0, %v1184_v63 }
 0x14b   : > { %1662 = vst [vmem:[%s2109_s8 + $0x78] sm:$0xff] %v1646_v1  }
 0x14c   : > { %1661 = vst [vmem:[%s2109_s8 + $0x70] sm:$0xff] %v1641_v2  }
 0x14d PF: > { %s14_s15 = sadd.s32 1, %s1937_s15  }
 0x14e   : > { %p11_p4 = scmp.ge.s32.totalorder %s14_s15, 4  }
 0x150   :  { %13 = sbr.rel (!%p11_p4) target bundleno = 1 (0x1), region = 68 }

</bundles_post_ra>
